<compile_context>
chip_gen: v5e
topology: v5e:2x2
jax: 0.10.0
libtpu: 0.0.40
codegen_flags: <defaults>
</compile_context>

<pallas_src>
import functools

import jax
import jax.numpy as jnp
from jax.experimental import pallas as pl
from jax.experimental.pallas import tpu as pltpu


def _round_up(x, m):
    return (x + m - 1) // m * m


def attention_kernel(x_ref, wqkv_ref, bqkv_ref, wproj_ref, bproj_ref, o_ref,
                     *, n_heads, head_dim, n_valid):
    bt, n_tok, d = x_ref.shape                      # block: (block_b, N_pad, D)

    # ---- QKV projection: one MXU matmul over all rows in the block ----
    # x arrives in bf16 (cast at the call site); accumulate in f32 on the MXU.
    x2d = x_ref[...].reshape(bt * n_tok, d)
    qkv = jnp.dot(x2d, wqkv_ref[...],
                  preferred_element_type=jnp.float32)         # (Bt*N, 3D) f32
    # Bias add in f32, then drop to bf16 once so every following relayout
    # (head split / merge) moves half the bytes and the MXU gets bf16 inputs.
    qkv = (qkv + bqkv_ref[0]).astype(jnp.bfloat16)

    # Lane-aligned splits (PyTorch reshape(B,N,3,H,Dh) => q|k|v contiguous,
    # each with head h occupying columns [h*Dh, (h+1)*Dh)). The attention
    # scale is already folded into the q columns of W_qkv / b_qkv.
    q = qkv[:, 0 * d:1 * d]
    k = qkv[:, 1 * d:2 * d]
    v = qkv[:, 2 * d:3 * d]

    # (Bt*N, D) -> (Bt*H, N, Dh): heads become a single LEADING batch dim so
    # the attention is two batched einsums that Mosaic lowers natively.
    # (A 4-D 'bqhd,bkhd->bhqk' form would avoid these relayouts but needs a
    # dot_general with non-leading batch dims; kept on the known-good path.)
    def to_heads(t):
        t = t.reshape(bt, n_tok, n_heads, head_dim)
        t = jnp.transpose(t, (0, 2, 1, 3))
        return t.reshape(bt * n_heads, n_tok, head_dim)

    q_h = to_heads(q)
    k_h = to_heads(k)
    v_h = to_heads(v)

    # Scores: contract the last dim of both operands directly (no explicit .T).
    s = jnp.einsum('gqd,gkd->gqk', q_h, k_h,
                   preferred_element_type=jnp.float32)        # (Bt*H, N, N) f32

    # Mask padded key columns (tokens >= n_valid) before softmax.
    if n_valid < n_tok:
        key_idx = jax.lax.broadcasted_iota(jnp.int32, (1, 1, n_tok), 2)
        s = jnp.where(key_idx < n_valid, s, jnp.float32(-1e30))

    # Numerically-stable softmax; exp in f32, reciprocal on the EUP.
    s_max = jnp.max(s, axis=-1, keepdims=True)
    p = jnp.exp(s - s_max)
    attn = p * pl.reciprocal(jnp.sum(p, axis=-1, keepdims=True), approx=True)
    # attn_drop with p_drop = 0.0 -> identity

    # P @ V, heads still batched; probabilities feed the MXU in bf16.
    wa = jnp.einsum('gqk,gkd->gqd', attn.astype(jnp.bfloat16), v_h,
                    preferred_element_type=jnp.float32)       # (Bt*H, N, Dh)

    # transpose(1,2).flatten(2): merge heads back along the feature axis.
    # Cast to bf16 first so the relayout moves half the bytes.
    merged = wa.astype(jnp.bfloat16).reshape(bt, n_heads, n_tok, head_dim)
    merged = jnp.transpose(merged, (0, 2, 1, 3)).reshape(bt * n_tok, d)

    # ---- output projection ----
    out = jnp.dot(merged, wproj_ref[...],
                  preferred_element_type=jnp.float32)
    out = out + bproj_ref[0]
    # proj_drop with p_drop = 0.0 -> identity

    o_ref[...] = out.reshape(bt, n_tok, d).astype(o_ref.dtype)


def _default_vmem_limit_bytes():
    """~75% of physical VMEM, capped at 100 MiB.

    v5e/v6e (128 MiB physical) -> 96 MiB; v7x (64 MiB physical) -> 48 MiB.
    Falls back to a v7x-safe 48 MiB if the hardware query is unavailable.
    """
    cap = None
    try:
        info = pltpu.get_tpu_info()
        cap = getattr(info, "vmem_capacity_bytes", None)
    except Exception:
        cap = None
    if not cap:
        cap = 64 * 1024 * 1024
    return min(int(cap) * 3 // 4, 100 * 1024 * 1024)


def _choose_block_b(B, n_pad, d, n_heads, vmem_limit_bytes, weight_bytes):
    """VMEM-aware block_b: largest batch block that fits, preferring
    >=2 grid steps, then MXU M >= 256, then >=4 steps, then the largest M."""
    # Leave room for the resident weights and some compiler slack, but never
    # let the budget collapse below a quarter of the limit (block_b=1 must
    # remain selectable; the compiler will complain if even that is too big).
    budget = max(vmem_limit_bytes - weight_bytes - (4 << 20),
                 vmem_limit_bytes // 4)

    def per_step_bytes(bb):
        m = bb * n_pad
        qkv_f32 = m * 3 * d * 4                           # f32 qkv result
        heads_bf16 = 3 * m * d * 2                        # head-major q/k/v (bf16)
        scores = 2 * bb * n_heads * n_pad * n_pad * 4     # s + p (f32)
        merge_out = m * d * (2 + 4)                       # merged bf16 + out f32
        io = 2 * (m * d * 2 + m * d * 4)                  # x(bf16)+out(f32), 2-deep
        return qkv_f32 + heads_bf16 + scores + merge_out + io

    divisors = [c for c in range(1, B + 1) if B % c == 0]
    feasible = [c for c in divisors if per_step_bytes(c) <= budget] or [1]

    m_target = 256  # >= two full 128-row MXU passes (one on v6e/v7x 256-wide)

    def rank(bb):
        m = bb * n_pad
        steps = B // bb
        return (min(steps, 2),      # >=2 steps: DMA overlap / both v7x cores
                m >= m_target,      # hit the MXU M target
                min(steps, 4),      # >=4 steps: >=2 per v7x core
                m)                  # then the largest block that fits

    return max(feasible, key=rank)


def attention_forward(x, wqkv, bqkv, wproj, bproj, *, n_heads,
                      block_b=None, vmem_limit_bytes=None):
    B, N, D = x.shape
    assert D % n_heads == 0, "embed_dim must be divisible by n_heads"
    head_dim = D // n_heads
    scale = float(head_dim) ** -0.5
    out_dtype = x.dtype

    # ---- token padding: lane-dense scores (last dim = N_pad) when cheap ----
    # Pad to a multiple of 128 if that costs at most ~2x tokens (ViT 197->256),
    # otherwise keep the sublane-aligned size (tiny harness N=8 stays 8).
    n8, n128 = _round_up(N, 8), _round_up(N, 128)
    n_pad = n128 if n128 <= 2 * n8 else n8

    if vmem_limit_bytes is None:
        vmem_limit_bytes = _default_vmem_limit_bytes()

    # ---- parameter prep (once, outside the kernel) ----
    # Fold the attention scale into the q-columns of W_qkv / b_qkv, then cast
    # weights to bf16 (MXU inputs, f32 accumulation). Biases stay f32.
    wqkv_s = wqkv.at[:, :D].multiply(scale).astype(jnp.bfloat16)
    bqkv_s = bqkv.at[:, :D].multiply(scale).astype(jnp.float32)
    wproj_bf = wproj.astype(jnp.bfloat16)
    bproj_f = bproj.astype(jnp.float32)

    # x: pad tokens and cast to bf16 at the call site (halves the x DMA; it
    # was cast to bf16 inside the kernel anyway).
    x_p = x if n_pad == N else jnp.pad(x, ((0, 0), (0, n_pad - N), (0, 0)))
    x_p = x_p.astype(jnp.bfloat16)

    weight_bytes = (D * 3 * D + D * D) * 2 + (3 * D + D) * 4
    if block_b is None:
        block_b = _choose_block_b(B, n_pad, D, n_heads,
                                  vmem_limit_bytes, weight_bytes)
    assert B % block_b == 0
    grid_b = B // block_b

    kernel = functools.partial(attention_kernel, n_heads=n_heads,
                               head_dim=head_dim, n_valid=N)

    def run(single_buffer_weights):
        def const_spec(shape):
            # Weights/biases have a constant block index -> they stay resident;
            # a single buffer saves their second VMEM copy.
            if single_buffer_weights:
                return pl.BlockSpec(shape, lambda b: (0, 0),
                                    pipeline_mode=pl.Buffered(1))
            return pl.BlockSpec(shape, lambda b: (0, 0))

        return pl.pallas_call(
            kernel,
            out_shape=jax.ShapeDtypeStruct((B, n_pad, D), out_dtype),
            grid_spec=pltpu.PrefetchScalarGridSpec(
                num_scalar_prefetch=0,
                grid=(grid_b,),
                in_specs=[
                    pl.BlockSpec((block_b, n_pad, D), lambda b: (b, 0, 0)),  # x
                    const_spec((D, 3 * D)),                                  # W_qkv
                    const_spec((1, 3 * D)),                                  # b_qkv
                    const_spec((D, D)),                                      # W_proj
                    const_spec((1, D)),                                      # b_proj
                ],
                out_specs=pl.BlockSpec((block_b, n_pad, D), lambda b: (b, 0, 0)),
            ),
            compiler_params=pltpu.CompilerParams(
                dimension_semantics=("parallel",),
                vmem_limit_bytes=vmem_limit_bytes,
            ),
        )(x_p, wqkv_s, bqkv_s, wproj_bf, bproj_f)

    try:
        out_p = run(True)
    except Exception:
        # pipeline_mode=pl.Buffered(1) not accepted by this jax build / TPU
        # lowering; fall back to default (double-buffered) weight specs.
        out_p = run(False)

    return out_p if n_pad == N else out_p[:, :N, :]


def reference_attention(x, wqkv, bqkv, wproj, bproj, *, n_heads):
    """Pure-JAX f32 reference mirroring the PyTorch forward."""
    B, N, D = x.shape
    head_dim = D // n_heads
    scale = head_dim ** -0.5
    qkv = x @ wqkv + bqkv[0]                                  # (B, N, 3D)
    qkv = qkv.reshape(B, N, 3, n_heads, head_dim)
    qkv = jnp.transpose(qkv, (2, 0, 3, 1, 4))                 # (3, B, H, N, Dh)
    q, k, v = qkv[0], qkv[1], qkv[2]
    dp = jnp.einsum('bhqd,bhkd->bhqk', q, k) * scale
    attn = jax.nn.softmax(dp, axis=-1)
    wa = jnp.einsum('bhqk,bhkd->bhqd', attn, v)               # (B, H, N, Dh)
    wa = jnp.transpose(wa, (0, 2, 1, 3)).reshape(B, N, D)
    return wa @ wproj + bproj[0]


def _run_case(key, B, N, D, n_heads):
    kx, k1, k2, k3, k4 = jax.random.split(key, 5)
    x = jax.random.normal(kx, (B, N, D), dtype=jnp.float32)
    wqkv = jax.random.normal(k1, (D, 3 * D), dtype=jnp.float32) * 0.02
    bqkv = jax.random.normal(k2, (1, 3 * D), dtype=jnp.float32) * 0.02
    wproj = jax.random.normal(k3, (D, D), dtype=jnp.float32) * 0.02
    bproj = jax.random.normal(k4, (1, D), dtype=jnp.float32) * 0.02

    out = attention_forward(x, wqkv, bqkv, wproj, bproj, n_heads=n_heads)
    out = jax.block_until_ready(out)

    ref = reference_attention(x, wqkv, bqkv, wproj, bproj, n_heads=n_heads)
    assert out.shape == (B, N, D)
    max_err = float(jnp.max(jnp.abs(out - ref)))
    # bf16 MXU inputs + approx reciprocal => compare at bf16-level tolerance.
    assert jnp.allclose(out, ref, atol=2e-2, rtol=2e-2), \
        f"max abs err ({B},{N},{D},h={n_heads}): {max_err}"


if __name__ == "__main__":
    key = jax.random.PRNGKey(0)
    k_a, k_b = jax.random.split(key, 2)

    # Small shapes consistent with the module (D multiple of 128 => lane-dense
    # output; n_heads is a module constructor arg, head_dim = D / n_heads).
    _run_case(k_a, B=2, N=8, D=128, n_heads=4)     # tiny, no token padding
    _run_case(k_b, B=2, N=100, D=128, n_heads=4)   # exercises pad-to-128 + key mask

    print("KERNEL_OK")
</pallas_src>

<mosaic_0001>
module attributes {stable_mosaic.version = 11 : i64} {
  func.func @attention_kernel(%arg0: i32, %arg1: memref<1x8x128xbf16, #tpu.memory_space<vmem>>, %arg2: memref<128x384xbf16, #tpu.memory_space<vmem>>, %arg3: memref<1x384xf32, #tpu.memory_space<vmem>>, %arg4: memref<128x128xbf16, #tpu.memory_space<vmem>>, %arg5: memref<1x128xf32, #tpu.memory_space<vmem>>, %arg6: memref<1x8x128xf32, #tpu.memory_space<vmem>>) attributes {dimension_semantics = [#tpu.dimension_semantics<parallel>], iteration_bounds = array<i64: 2>, scalar_prefetch = 0 : i64, scratch_operands = 0 : i64, tpu.core_type = #tpu.core_type<tc>, window_params = [{transform_indices = @transform_0, window_bounds = array<i64: 1, 8, 128>}, {pipeline_mode = #tpu.pipeline_mode<synchronous>, transform_indices = @transform_1, window_bounds = array<i64: 128, 384>}, {pipeline_mode = #tpu.pipeline_mode<synchronous>, transform_indices = @transform_2, window_bounds = array<i64: 1, 384>}, {pipeline_mode = #tpu.pipeline_mode<synchronous>, transform_indices = @transform_3, window_bounds = array<i64: 128, 128>}, {pipeline_mode = #tpu.pipeline_mode<synchronous>, transform_indices = @transform_4, window_bounds = array<i64: 1, 128>}, {transform_indices = @transform_5, window_bounds = array<i64: 1, 8, 128>}]} {
    %c0 = arith.constant 0 : index
    %c0_0 = arith.constant 0 : index
    %c0_1 = arith.constant 0 : index
    %0 = vector.load %arg1[%c0, %c0_0, %c0_1] : memref<1x8x128xbf16, #tpu.memory_space<vmem>>, vector<1x8x128xbf16>
    %1 = vector.shape_cast %0 : vector<1x8x128xbf16> to vector<8x128xbf16>
    %c0_2 = arith.constant 0 : index
    %c0_3 = arith.constant 0 : index
    %2 = vector.load %arg2[%c0_2, %c0_3] : memref<128x384xbf16, #tpu.memory_space<vmem>>, vector<128x384xbf16>
    %cst = arith.constant dense<0.000000e+00> : vector<8x384xf32>
    %3 = tpu.matmul %1, %2, %cst {dimension_numbers = #tpu.dot_dimension_numbers<[1], [0], [0], [1], [0, 0, 1, 1], [], []>} : vector<8x128xbf16>, vector<128x384xbf16>, vector<8x384xf32> -> vector<8x384xf32>
    %c0_4 = arith.constant 0 : index
    %c0_5 = arith.constant 0 : index
    %4 = vector.load %arg3[%c0_4, %c0_5] : memref<1x384xf32, #tpu.memory_space<vmem>>, vector<1x384xf32>
    %5 = vector.shape_cast %4 : vector<1x384xf32> to vector<384xf32>
    %6 = vector.shape_cast %5 : vector<384xf32> to vector<1x384xf32>
    %7 = vector.broadcast %6 : vector<1x384xf32> to vector<8x384xf32>
    %8 = arith.addf %3, %7 : vector<8x384xf32>
    %9 = arith.truncf %8 : vector<8x384xf32> to vector<8x384xbf16>
    %10 = vector.extract_strided_slice %9 {offsets = [0, 0], sizes = [8, 128], strides = [1, 1]} : vector<8x384xbf16> to vector<8x128xbf16>
    %11 = vector.extract_strided_slice %9 {offsets = [0, 128], sizes = [8, 128], strides = [1, 1]} : vector<8x384xbf16> to vector<8x128xbf16>
    %12 = vector.extract_strided_slice %9 {offsets = [0, 256], sizes = [8, 128], strides = [1, 1]} : vector<8x384xbf16> to vector<8x128xbf16>
    %13 = vector.shape_cast %10 : vector<8x128xbf16> to vector<1x8x4x32xbf16>
    %14 = tpu.transpose %13, [0, 2, 1, 3] : vector<1x8x4x32xbf16> -> vector<1x4x8x32xbf16>
    %15 = vector.shape_cast %14 : vector<1x4x8x32xbf16> to vector<4x8x32xbf16>
    %16 = vector.shape_cast %11 : vector<8x128xbf16> to vector<1x8x4x32xbf16>
    %17 = tpu.transpose %16, [0, 2, 1, 3] : vector<1x8x4x32xbf16> -> vector<1x4x8x32xbf16>
    %18 = vector.shape_cast %17 : vector<1x4x8x32xbf16> to vector<4x8x32xbf16>
    %19 = vector.shape_cast %12 : vector<8x128xbf16> to vector<1x8x4x32xbf16>
    %20 = tpu.transpose %19, [0, 2, 1, 3] : vector<1x8x4x32xbf16> -> vector<1x4x8x32xbf16>
    %21 = vector.shape_cast %20 : vector<1x4x8x32xbf16> to vector<4x8x32xbf16>
    "tpu.trace_start"() <{level = 10 : i32, message = "gqd,gkd->gqk"}> : () -> ()
    %cst_6 = arith.constant dense<0.000000e+00> : vector<4x8x8xf32>
    %22 = tpu.matmul %15, %18, %cst_6 {dimension_numbers = #tpu.dot_dimension_numbers<[2], [2], [1], [1], [0, 0, 0, 1, 1, 1], [0], [0]>} : vector<4x8x32xbf16>, vector<4x8x32xbf16>, vector<4x8x8xf32> -> vector<4x8x8xf32>
    "tpu.trace_stop"() : () -> ()
    %cst_7 = arith.constant dense<0xFF800000> : vector<4x8xf32>
    %23 = vector.multi_reduction <maximumf>, %22, %cst_7 [2] : vector<4x8x8xf32> to vector<4x8xf32>
    %24 = vector.shape_cast %23 : vector<4x8xf32> to vector<4x8x1xf32>
    %25 = vector.broadcast %24 : vector<4x8x1xf32> to vector<4x8x8xf32>
    %26 = arith.subf %22, %25 : vector<4x8x8xf32>
    %27 = math.exp %26 : vector<4x8x8xf32>
    %cst_8 = arith.constant dense<0.000000e+00> : vector<4x8xf32>
    %28 = vector.multi_reduction <add>, %27, %cst_8 [2] : vector<4x8x8xf32> to vector<4x8xf32>
    %29 = vector.shape_cast %28 : vector<4x8xf32> to vector<4x8x1xf32>
    %30 = tpu.reciprocal %29 {approx = true} : vector<4x8x1xf32> -> vector<4x8x1xf32>
    %31 = vector.broadcast %30 : vector<4x8x1xf32> to vector<4x8x8xf32>
    %32 = arith.mulf %27, %31 : vector<4x8x8xf32>
    %33 = arith.truncf %32 : vector<4x8x8xf32> to vector<4x8x8xbf16>
    "tpu.trace_start"() <{level = 10 : i32, message = "gqk,gkd->gqd"}> : () -> ()
    %cst_9 = arith.constant dense<0.000000e+00> : vector<4x8x32xf32>
    %34 = tpu.matmul %33, %21, %cst_9 {dimension_numbers = #tpu.dot_dimension_numbers<[2], [1], [1], [2], [0, 0, 0, 1, 1, 2], [0], [0]>} : vector<4x8x8xbf16>, vector<4x8x32xbf16>, vector<4x8x32xf32> -> vector<4x8x32xf32>
    "tpu.trace_stop"() : () -> ()
    %35 = arith.truncf %34 : vector<4x8x32xf32> to vector<4x8x32xbf16>
    %36 = vector.shape_cast %35 : vector<4x8x32xbf16> to vector<1x4x8x32xbf16>
    %37 = tpu.transpose %36, [0, 2, 1, 3] : vector<1x4x8x32xbf16> -> vector<1x8x4x32xbf16>
    %38 = vector.shape_cast %37 : vector<1x8x4x32xbf16> to vector<8x128xbf16>
    %c0_10 = arith.constant 0 : index
    %c0_11 = arith.constant 0 : index
    %39 = vector.load %arg4[%c0_10, %c0_11] : memref<128x128xbf16, #tpu.memory_space<vmem>>, vector<128x128xbf16>
    %cst_12 = arith.constant dense<0.000000e+00> : vector<8x128xf32>
    %40 = tpu.matmul %38, %39, %cst_12 {dimension_numbers = #tpu.dot_dimension_numbers<[1], [0], [0], [1], [0, 0, 1, 1], [], []>} : vector<8x128xbf16>, vector<128x128xbf16>, vector<8x128xf32> -> vector<8x128xf32>
    %c0_13 = arith.constant 0 : index
    %c0_14 = arith.constant 0 : index
    %41 = vector.load %arg5[%c0_13, %c0_14] : memref<1x128xf32, #tpu.memory_space<vmem>>, vector<1x128xf32>
    %42 = vector.shape_cast %41 : vector<1x128xf32> to vector<128xf32>
    %43 = vector.shape_cast %42 : vector<128xf32> to vector<1x128xf32>
    %44 = vector.broadcast %43 : vector<1x128xf32> to vector<8x128xf32>
    %45 = arith.addf %40, %44 : vector<8x128xf32>
    %46 = vector.shape_cast %45 : vector<8x128xf32> to vector<1x8x128xf32>
    %c0_15 = arith.constant 0 : index
    %c0_16 = arith.constant 0 : index
    %c0_17 = arith.constant 0 : index
    %47 = vector.load %arg6[%c0_15, %c0_16, %c0_17] : memref<1x8x128xf32, #tpu.memory_space<vmem>>, vector<1x8x128xf32>
    tpu.vector_store %arg6[%c0_15, %c0_16, %c0_17], %46 {strides = array<i32>} : memref<1x8x128xf32, #tpu.memory_space<vmem>>, vector<1x8x128xf32>,
    return
  }
  func.func @transform_0(%arg0: i32) -> (i32, i32, i32) {
    %c0_i32 = arith.constant 0 : i32
    %c0_i32_0 = arith.constant 0 : i32
    %c0_i32_1 = arith.constant 0 : i32
    return %arg0, %c0_i32, %c0_i32_0 : i32, i32, i32
  }
  func.func @transform_1(%arg0: i32) -> (i32, i32) {
    %c0_i32 = arith.constant 0 : i32
    %c0_i32_0 = arith.constant 0 : i32
    %c0_i32_1 = arith.constant 0 : i32
    return %c0_i32, %c0_i32_0 : i32, i32
  }
  func.func @transform_2(%arg0: i32) -> (i32, i32) {
    %c0_i32 = arith.constant 0 : i32
    %c0_i32_0 = arith.constant 0 : i32
    %c0_i32_1 = arith.constant 0 : i32
    return %c0_i32, %c0_i32_0 : i32, i32
  }
  func.func @transform_3(%arg0: i32) -> (i32, i32) {
    %c0_i32 = arith.constant 0 : i32
    %c0_i32_0 = arith.constant 0 : i32
    %c0_i32_1 = arith.constant 0 : i32
    return %c0_i32, %c0_i32_0 : i32, i32
  }
  func.func @transform_4(%arg0: i32) -> (i32, i32) {
    %c0_i32 = arith.constant 0 : i32
    %c0_i32_0 = arith.constant 0 : i32
    %c0_i32_1 = arith.constant 0 : i32
    return %c0_i32, %c0_i32_0 : i32, i32
  }
  func.func @transform_5(%arg0: i32) -> (i32, i32, i32) {
    %c0_i32 = arith.constant 0 : i32
    %c0_i32_0 = arith.constant 0 : i32
    %c0_i32_1 = arith.constant 0 : i32
    return %arg0, %c0_i32, %c0_i32_0 : i32, i32, i32
  }
}

module attributes {stable_mosaic.version = 11 : i64} {
  func.func @attention_kernel(%arg0: i32, %arg1: memref<1x8x128xbf16, #tpu.memory_space<vmem>>, %arg2: memref<128x384xbf16, #tpu.memory_space<vmem>>, %arg3: memref<1x384xf32, #tpu.memory_space<vmem>>, %arg4: memref<128x128xbf16, #tpu.memory_space<vmem>>, %arg5: memref<1x128xf32, #tpu.memory_space<vmem>>, %arg6: memref<1x8x128xf32, #tpu.memory_space<vmem>>) attributes {dimension_semantics = [#tpu.dimension_semantics<parallel>], iteration_bounds = array<i64: 2>, scalar_prefetch = 0 : i64, scratch_operands = 0 : i64, tpu.core_type = #tpu.core_type<tc>, window_params = [{transform_indices = @transform_0, window_bounds = array<i64: 1, 8, 128>}, {pipeline_mode = #tpu.pipeline_mode<synchronous>, transform_indices = @transform_1, window_bounds = array<i64: 128, 384>}, {pipeline_mode = #tpu.pipeline_mode<synchronous>, transform_indices = @transform_2, window_bounds = array<i64: 1, 384>}, {pipeline_mode = #tpu.pipeline_mode<synchronous>, transform_indices = @transform_3, window_bounds = array<i64: 128, 128>}, {pipeline_mode = #tpu.pipeline_mode<synchronous>, transform_indices = @transform_4, window_bounds = array<i64: 1, 128>}, {transform_indices = @transform_5, window_bounds = array<i64: 1, 8, 128>}]} {
    %c0 = arith.constant 0 : index
    %c0_0 = arith.constant 0 : index
    %c0_1 = arith.constant 0 : index
    %0 = vector.load %arg1[%c0, %c0_0, %c0_1] : memref<1x8x128xbf16, #tpu.memory_space<vmem>>, vector<1x8x128xbf16>
    %1 = vector.shape_cast %0 : vector<1x8x128xbf16> to vector<8x128xbf16>
    %c0_2 = arith.constant 0 : index
    %c0_3 = arith.constant 0 : index
    %2 = vector.load %arg2[%c0_2, %c0_3] : memref<128x384xbf16, #tpu.memory_space<vmem>>, vector<128x384xbf16>
    %cst = arith.constant dense<0.000000e+00> : vector<8x384xf32>
    %3 = tpu.matmul %1, %2, %cst {dimension_numbers = #tpu.dot_dimension_numbers<[1], [0], [0], [1], [0, 0, 1, 1], [], []>} : vector<8x128xbf16>, vector<128x384xbf16>, vector<8x384xf32> -> vector<8x384xf32>
    %c0_4 = arith.constant 0 : index
    %c0_5 = arith.constant 0 : index
    %4 = vector.load %arg3[%c0_4, %c0_5] : memref<1x384xf32, #tpu.memory_space<vmem>>, vector<1x384xf32>
    %5 = vector.shape_cast %4 : vector<1x384xf32> to vector<384xf32>
    %6 = vector.shape_cast %5 : vector<384xf32> to vector<1x384xf32>
    %7 = vector.broadcast %6 : vector<1x384xf32> to vector<8x384xf32>
    %8 = arith.addf %3, %7 : vector<8x384xf32>
    %9 = arith.truncf %8 : vector<8x384xf32> to vector<8x384xbf16>
    %10 = vector.extract_strided_slice %9 {offsets = [0, 0], sizes = [8, 128], strides = [1, 1]} : vector<8x384xbf16> to vector<8x128xbf16>
    %11 = vector.extract_strided_slice %9 {offsets = [0, 128], sizes = [8, 128], strides = [1, 1]} : vector<8x384xbf16> to vector<8x128xbf16>
    %12 = vector.extract_strided_slice %9 {offsets = [0, 256], sizes = [8, 128], strides = [1, 1]} : vector<8x384xbf16> to vector<8x128xbf16>
    %13 = vector.shape_cast %10 : vector<8x128xbf16> to vector<1x8x4x32xbf16>
    %14 = tpu.transpose %13, [0, 2, 1, 3] : vector<1x8x4x32xbf16> -> vector<1x4x8x32xbf16>
    %15 = vector.shape_cast %14 : vector<1x4x8x32xbf16> to vector<4x8x32xbf16>
    %16 = vector.shape_cast %11 : vector<8x128xbf16> to vector<1x8x4x32xbf16>
    %17 = tpu.transpose %16, [0, 2, 1, 3] : vector<1x8x4x32xbf16> -> vector<1x4x8x32xbf16>
    %18 = vector.shape_cast %17 : vector<1x4x8x32xbf16> to vector<4x8x32xbf16>
    %19 = vector.shape_cast %12 : vector<8x128xbf16> to vector<1x8x4x32xbf16>
    %20 = tpu.transpose %19, [0, 2, 1, 3] : vector<1x8x4x32xbf16> -> vector<1x4x8x32xbf16>
    %21 = vector.shape_cast %20 : vector<1x4x8x32xbf16> to vector<4x8x32xbf16>
    "tpu.trace_start"() <{level = 10 : i32, message = "gqd,gkd->gqk"}> : () -> ()
    %cst_6 = arith.constant dense<0.000000e+00> : vector<4x8x8xf32>
    %22 = tpu.matmul %15, %18, %cst_6 {dimension_numbers = #tpu.dot_dimension_numbers<[2], [2], [1], [1], [0, 0, 0, 1, 1, 1], [0], [0]>} : vector<4x8x32xbf16>, vector<4x8x32xbf16>, vector<4x8x8xf32> -> vector<4x8x8xf32>
    "tpu.trace_stop"() : () -> ()
    %cst_7 = arith.constant dense<0xFF800000> : vector<4x8xf32>
    %23 = vector.multi_reduction <maximumf>, %22, %cst_7 [2] : vector<4x8x8xf32> to vector<4x8xf32>
    %24 = vector.shape_cast %23 : vector<4x8xf32> to vector<4x8x1xf32>
    %25 = vector.broadcast %24 : vector<4x8x1xf32> to vector<4x8x8xf32>
    %26 = arith.subf %22, %25 : vector<4x8x8xf32>
    %27 = math.exp %26 : vector<4x8x8xf32>
    %cst_8 = arith.constant dense<0.000000e+00> : vector<4x8xf32>
    %28 = vector.multi_reduction <add>, %27, %cst_8 [2] : vector<4x8x8xf32> to vector<4x8xf32>
    %29 = vector.shape_cast %28 : vector<4x8xf32> to vector<4x8x1xf32>
    %30 = tpu.reciprocal %29 {approx = true} : vector<4x8x1xf32> -> vector<4x8x1xf32>
    %31 = vector.broadcast %30 : vector<4x8x1xf32> to vector<4x8x8xf32>
    %32 = arith.mulf %27, %31 : vector<4x8x8xf32>
    %33 = arith.truncf %32 : vector<4x8x8xf32> to vector<4x8x8xbf16>
    "tpu.trace_start"() <{level = 10 : i32, message = "gqk,gkd->gqd"}> : () -> ()
    %cst_9 = arith.constant dense<0.000000e+00> : vector<4x8x32xf32>
    %34 = tpu.matmul %33, %21, %cst_9 {dimension_numbers = #tpu.dot_dimension_numbers<[2], [1], [1], [2], [0, 0, 0, 1, 1, 2], [0], [0]>} : vector<4x8x8xbf16>, vector<4x8x32xbf16>, vector<4x8x32xf32> -> vector<4x8x32xf32>
    "tpu.trace_stop"() : () -> ()
    %35 = arith.truncf %34 : vector<4x8x32xf32> to vector<4x8x32xbf16>
    %36 = vector.shape_cast %35 : vector<4x8x32xbf16> to vector<1x4x8x32xbf16>
    %37 = tpu.transpose %36, [0, 2, 1, 3] : vector<1x4x8x32xbf16> -> vector<1x8x4x32xbf16>
    %38 = vector.shape_cast %37 : vector<1x8x4x32xbf16> to vector<8x128xbf16>
    %c0_10 = arith.constant 0 : index
    %c0_11 = arith.constant 0 : index
    %39 = vector.load %arg4[%c0_10, %c0_11] : memref<128x128xbf16, #tpu.memory_space<vmem>>, vector<128x128xbf16>
    %cst_12 = arith.constant dense<0.000000e+00> : vector<8x128xf32>
    %40 = tpu.matmul %38, %39, %cst_12 {dimension_numbers = #tpu.dot_dimension_numbers<[1], [0], [0], [1], [0, 0, 1, 1], [], []>} : vector<8x128xbf16>, vector<128x128xbf16>, vector<8x128xf32> -> vector<8x128xf32>
    %c0_13 = arith.constant 0 : index
    %c0_14 = arith.constant 0 : index
    %41 = vector.load %arg5[%c0_13, %c0_14] : memref<1x128xf32, #tpu.memory_space<vmem>>, vector<1x128xf32>
    %42 = vector.shape_cast %41 : vector<1x128xf32> to vector<128xf32>
    %43 = vector.shape_cast %42 : vector<128xf32> to vector<1x128xf32>
    %44 = vector.broadcast %43 : vector<1x128xf32> to vector<8x128xf32>
    %45 = arith.addf %40, %44 : vector<8x128xf32>
    %46 = vector.shape_cast %45 : vector<8x128xf32> to vector<1x8x128xf32>
    %c0_15 = arith.constant 0 : index
    %c0_16 = arith.constant 0 : index
    %c0_17 = arith.constant 0 : index
    %47 = vector.load %arg6[%c0_15, %c0_16, %c0_17] : memref<1x8x128xf32, #tpu.memory_space<vmem>>, vector<1x8x128xf32>
    tpu.vector_store %arg6[%c0_15, %c0_16, %c0_17], %46 {strides = array<i32>} : memref<1x8x128xf32, #tpu.memory_space<vmem>>, vector<1x8x128xf32>,
    return
  }
  func.func @transform_0(%arg0: i32) -> (i32, i32, i32) {
    %c0_i32 = arith.constant 0 : i32
    %c0_i32_0 = arith.constant 0 : i32
    %c0_i32_1 = arith.constant 0 : i32
    return %arg0, %c0_i32, %c0_i32_0 : i32, i32, i32
  }
  func.func @transform_1(%arg0: i32) -> (i32, i32) {
    %c0_i32 = arith.constant 0 : i32
    %c0_i32_0 = arith.constant 0 : i32
    %c0_i32_1 = arith.constant 0 : i32
    return %c0_i32, %c0_i32_0 : i32, i32
  }
  func.func @transform_2(%arg0: i32) -> (i32, i32) {
    %c0_i32 = arith.constant 0 : i32
    %c0_i32_0 = arith.constant 0 : i32
    %c0_i32_1 = arith.constant 0 : i32
    return %c0_i32, %c0_i32_0 : i32, i32
  }
  func.func @transform_3(%arg0: i32) -> (i32, i32) {
    %c0_i32 = arith.constant 0 : i32
    %c0_i32_0 = arith.constant 0 : i32
    %c0_i32_1 = arith.constant 0 : i32
    return %c0_i32, %c0_i32_0 : i32, i32
  }
  func.func @transform_4(%arg0: i32) -> (i32, i32) {
    %c0_i32 = arith.constant 0 : i32
    %c0_i32_0 = arith.constant 0 : i32
    %c0_i32_1 = arith.constant 0 : i32
    return %c0_i32, %c0_i32_0 : i32, i32
  }
  func.func @transform_5(%arg0: i32) -> (i32, i32, i32) {
    %c0_i32 = arith.constant 0 : i32
    %c0_i32_0 = arith.constant 0 : i32
    %c0_i32_1 = arith.constant 0 : i32
    return %arg0, %c0_i32, %c0_i32_0 : i32, i32, i32
  }
}

</mosaic_0001>

<bundles_post_ra>
// kernel: tpu_custom_call.1
= control target key start
LH: loop header
LB: loop body
LE: loop exit
PB: predicated region body
PF: predicated region fallthrough
CT: control target
= control target key end

     0   :  { %10 = vsyncpa [#allocation3], 0  ;;  %s2278_s0 = inlined_call_operand.hbm [shape: bf16[2,8,128], index: 0, kind: input, shape index: {}]   ;;  %s2279_s1 = inlined_call_operand.hbm [shape: bf16[128,384], index: 1, kind: input, shape index: {}]   ;;  %s2280_s2 = inlined_call_operand.hbm [shape: f32[1,384], index: 2, kind: input, shape index: {}]   ;;  %s2281_s3 = inlined_call_operand.hbm [shape: bf16[128,128], index: 3, kind: input, shape index: {}]   ;;  %s2282_s4 = inlined_call_operand.vmem [shape: f32[1,128], index: 4, kind: input, shape index: {}]   ;;  %s2283_s5 = inlined_call_operand.hbm [shape: f32[2,8,128], index: 5, kind: output, shape index: {}]  }
   0x1   :  { %12 = vsyncpa [#allocation3 + $0x1], 0 }
   0x2   :  { %13 = vsyncpa [#allocation6], 0 }
   0x3   :  { %14 = vsyncpa [#allocation9], 0 }
   0x4   :  { %15 = vsyncpa [#allocation4], 0 }
   0x5   :  { %17 = vsyncpa [#allocation4 + $0x1], 0  ;;  %s1929_s18 = smov 0   ;;  %s1931_s19 = smov 0  }
   0x6   :  { %s1933_s20 = smov 0   ;;  %s1935_s21 = smov 0  }
   0x7 LB: > { %s175_s24 = sshll.u32 %s2279_s1, 4  ;;  %s1953_s25 = sadd.s32 4294967295, %s1885_s21   ;;  %s1885_s21 = sphi %s1935_s21, %s2294_s21   ;;  %s1881_s20 = sphi %s1933_s20, %s2293_s20   ;;  %s1877_s19 = sphi %s1931_s19, %s2292_s19   ;;  %s1873_s18 = sphi %s1929_s18, %s2291_s18   ;;  %s176_s24 = int_to_ptr.hbm [resolvable:$true] %s175_s24 }
   0x8   : > { %p1403_p0 = scmp.ge.s32.totalorder %s1885_s21, 1  ;;  %p44_p1 = scmp.eq.s32.totalorder %s1953_s25, 0 }
   0x9   : > { %p164_p2 = scmp.lt.s32.totalorder %s1885_s21, 3  ;;  %s1887_s27 = smov [#allocation5]  }
   0xa   : > { %s177_s28 = sshll.u32 %s1887_s27, 4  ;;  %s190_s6 = sshll.u32 %s2280_s2, 4  ;;  %s178_s28 = int_to_ptr.vmem [resolvable:$true] %s177_s28  ;;  %s191_s6 = int_to_ptr.hbm [resolvable:$true] %s190_s6 }
   0xb   : > { %p1958_p3 = pnand %p1403_p0, %p164_p2  ;;  %s201_s10 = sshll.u32 %s2281_s3, 4  ;;  %s202_s10 = int_to_ptr.hbm [resolvable:$true] %s201_s10 }
   0xc   : > { %s1888_s11 = smov [#allocation7]   ;;  %s1889_s13 = smov 192  }
   0xd   : > { %p1604_p4 = pneg %p1958_p3  ;;  %s192_s12 = sshll.u32 %s1888_s11, 4  ;;  %s193_s12 = int_to_ptr.vmem [resolvable:$true] %s192_s12 }
   0xe   : > { %s1890_s14 = smov 12   ;;  %s1891_s15 = smov [#allocation8]  }
   0xf   : > { %p1970_p6 = pnand %p1604_p4, %p44_p1  ;;  %s203_s16 = sshll.u32 %s1891_s15, 4  ;;  %s204_s16 = int_to_ptr.vmem [resolvable:$true] %s203_s16 }
  0x10   : > { %s1892_s17 = smov 64   ;;  %s1893_s22 = smov 4  }
  0x11   : > { %1607 = dma.hbm_to_vmem [thread:$0]  (!%p1970_p6), %s176_s24, 3072, %s178_s28, [#allocation6], %s1889_s13, %s1889_s13, %s1890_s14  }
  0x12   : > { %1610 = dma.hbm_to_vmem [thread:$0]  (!%p1970_p6), %s191_s6, 48, %s193_s12, [#allocation6]  }
  0x13   : > { %1613 = dma.hbm_to_vmem [thread:$0]  (!%p1970_p6), %s202_s10, 1024, %s204_s16, [#allocation9], %s1892_s17, %s1892_s17, %s1893_s22  }
  0x14   : > { %s1402_s23 = sadd.s32 4294967294, %s1885_s21   ;;  %s1985_s24 = sadd.s32 1, %s1885_s21  }
  0x15   : > { %s30_s27 = sadd.s32 1, %s1881_s20  ;;  %s27_s28 = ssub.s32 %s1885_s21, %s1985_s24 }
  0x16   : > { %p37_p7 = scmp.ne.s32.totalorder %s1881_s20, %s1877_s19  ;;  %p28_p8 = scmp.eq.s32.totalorder %s27_s28, 0 }
  0x17   : > { %p38_p9 = scmp.eq.s32.totalorder %s1885_s21, 0  ;;  %p43_p10 = scmp.ne.s32.totalorder %s1877_s19, %s1873_s18 }
  0x18   : > { %p151_p11 = scmp.eq.s32.totalorder %s1953_s25, 1  ;;  %p157_p0 = scmp.eq.s32.totalorder %s1402_s23, 1 }
  0x19   : > { %s1997_s29 = scalar_select %p28_p8, %s1881_s20, %s30_s27  }
  0x1a   : > { %p2001_p12 = por %p44_p1, %p43_p10  ;;  %p2005_p13 = por %p151_p11, %p37_p7 }
  0x1b   : > { %p39_p2 = por %p38_p9, %p37_p7  ;;  %s220_s7 = sand.u32 1, %s1881_s20  }
  0x1c   : > { %p2010_p4 = por %p157_p0, %p43_p10  ;;  %p1625_p6 = scmp.lt.s32.totalorder %s1885_s21, 2 }
  0x1d   : > { %s1408_s9 = sshll.u32 %s220_s7, 2  ;;  %s1409_s10 = sshll.u32 %s1885_s21, 2 }
  0x1e   : > { %s228_s13 = scalar_lea.hbm %s2278_s0, %s1409_s10  ;;  %s224_s15 = scalar_lea.vmem [#allocation2], %s1408_s9 }
  0x1f   : > { %s230_s14 = sshll.u32 %s228_s13, 4  ;;  %s232_s16 = sshll.u32 %s224_s15, 4  ;;  %s231_s14 = int_to_ptr.hbm [resolvable:$true] %s230_s14  ;;  %s233_s16 = int_to_ptr.vmem [resolvable:$true] %s232_s16 }
  0x20   : > { %p2019_p8 = pnand %p1625_p6, %p39_p2  ;;  %s221_s22 = scalar_lea.sflag [#allocation3], %s220_s7 }
  0x21   : > { %s1781_s23 = sshra.s32 %s231_s14, 4  ;;  %s1788_s9 = scalar_lea.hbm %s2278_s0, 8  ;;  %s1782_s23 = int_to_ptr.hbm [resolvable:$true] %s1781_s23 }
  0x22   : > { %s1783_s27 = scalar_lea.hbm %s1782_s23, 4  ;;  %p1785_p9 = pneg %p2019_p8 }
  0x23   : > { %p1784_p7 = scmp.ne.s32.totalorder %s1782_s23, %s1783_s27  ;;  %p1789_p0 = scmp.lt.s32.totalorder %s1782_s23, %s2278_s0 }
  0x24   : > { %p1790_p2 = scmp.lt.s32.totalorder %s1788_s9, %s1783_s27 }
  0x25   : > { %p1786_p10 = pnand %p1785_p9, %p1784_p7 }
  0x26   : > { %p1791_p6 = por %p1790_p2, %p1789_p0 }
  0x27   : > { %p1787_p11 = pneg %p1786_p10 }
  0x29   : > { %p1792_p5 = pnand %p1791_p6, %p1787_p11 }
  0x2b   : > { %1795 = shalt.err (!%p1792_p5)
}
  0x2c   : > { %1617 = dma.hbm_to_vmem [thread:$0]  (!%p2019_p8), %s231_s14, 64, %s233_s16, %s221_s22  }
  0x2d   : > { %241 = sbr.rel (%p1958_p3) target bundleno = 1222 (0x4c6), region = 40  ;;  %s2036_s7 = sand.u32 (!%p1958_p3), 1, %s1877_s19  }
  0x2e   : > { %s1411_s13 = sshll.u32 (!%p1958_p3), %s2036_s7, 2  ;;  %s244_s15 = scalar_lea.sflag (!%p1958_p3), [#allocation3], %s2036_s7 }
  0x2f   : > { %s2040_s28 = scalar_lea.vmem (!%p1958_p3), [#allocation2], %s1411_s13 }
  0x32   : > { %1856 = dma.done.wait (%p2001_p12), %s244_s15, 64  }
  0x33   : > { %1858 = vsyncadd (%p2001_p12), %s244_s15, 4294967232 }
  0x34   : > { %1860 = dma.done.wait (%p44_p1), [#allocation6], 3120  }
  0x35   : > { %1862 = vsyncadd (%p44_p1), [#allocation6], 4294964176 }
  0x36   : > { %1864 = dma.done.wait (%p44_p1), [#allocation9], 1024  }
  0x37   : > { %1866 = vsyncadd (%p44_p1), [#allocation9], 4294966272  ;;  %v1502_v0 = vld [vmem:[#allocation5 + $0xa8] sm:$0xf]  ;;  %v1578_v1 = vld [vmem:[#allocation5 + $0xb0] sm:$0xf0] }
  0x38   : > { %v1577_v2 = vld [vmem:[#allocation5 + $0xac] sm:$0xf]  ;;  %v1503_v3 = vor.u32 %v1578_v1, %v1502_v0  ;;  %v1504_v4 = vld [vmem:[#allocation5 + $0xb4] sm:$0xf0]  ;;  %v1490_v5 = vld [vmem:[#allocation5 + $0x90] sm:$0xf] }
  0x39   : > { %v1575_v6 = vld [vmem:[#allocation5 + $0x98] sm:$0xf0]  ;;  %v1507_v7 = vor.u32 %v1577_v2, %v1504_v4  ;;  %v1574_v8 = vld [vmem:[#allocation5 + $0x94] sm:$0xf]  ;;  %v1492_v9 = vld [vmem:[#allocation5 + $0x9c] sm:$0xf0] }
  0x3a   : > { %460 = vmatpush.bf16.msra.mxu0 %v1503_v3  ;;  %v1491_v10 = vor.u32 %v1575_v6, %v1490_v5  ;;  %v1495_v11 = vor.u32 %v1574_v8, %v1492_v9  ;;  %v1478_v12 = vld [vmem:[#allocation5 + $0x78] sm:$0xf]  ;;  %v1572_v13 = vld [vmem:[#allocation5 + $0x80] sm:$0xf0]  ;;  %v1571_v14 = vld [vmem:[#allocation5 + $0x7c] sm:$0xf] }
  0x3b   : > { %473 = vmatpush.bf16.msra.mxu1 %v1507_v7  ;;  %v1480_v15 = vld [vmem:[#allocation5 + $0x84] sm:$0xf0]  ;;  %v1479_v16 = vor.u32 %v1572_v13, %v1478_v12  ;;  %v1466_v18 = vld [vmem:[#allocation5 + $0x60] sm:$0xf]  ;;  %v1569_v19 = vld [vmem:[#allocation5 + $0x68] sm:$0xf0] }
  0x3c   : > { %v1483_v17 = vor.u32 %v1571_v14, %v1480_v15  ;;  %v1568_v20 = vld [vmem:[#allocation5 + $0x64] sm:$0xf]  ;;  %v1468_v21 = vld [vmem:[#allocation5 + $0x6c] sm:$0xf0]  ;;  %v1467_v22 = vor.u32 %v1569_v19, %v1466_v18  ;;  %v1454_v24 = vld [vmem:[#allocation5 + $0x48] sm:$0xf] }
  0x3d   : > { %v1471_v23 = vor.u32 %v1568_v20, %v1468_v21  ;;  %v1566_v25 = vld [vmem:[#allocation5 + $0x50] sm:$0xf0]  ;;  %v1565_v26 = vld [vmem:[#allocation5 + $0x4c] sm:$0xf]  ;;  %v1456_v27 = vld [vmem:[#allocation5 + $0x54] sm:$0xf0] }
  0x3e   : > { %461 = vmatpush.bf16.msra.mxu0 %v1491_v10  ;;  %v1455_v28 = vor.u32 %v1566_v25, %v1454_v24  ;;  %v1459_v29 = vor.u32 %v1565_v26, %v1456_v27  ;;  %v1442_v30 = vld [vmem:[#allocation5 + $0x30] sm:$0xf]  ;;  %v1563_v31 = vld [vmem:[#allocation5 + $0x38] sm:$0xf0]  ;;  %v1562_v32 = vld [vmem:[#allocation5 + $0x34] sm:$0xf] }
  0x3f   : > { %474 = vmatpush.bf16.msra.mxu1 %v1495_v11  ;;  %v1444_v33 = vld [vmem:[#allocation5 + $0x3c] sm:$0xf0]  ;;  %v1443_v34 = vor.u32 %v1563_v31, %v1442_v30  ;;  %v1430_v36 = vld [vmem:[#allocation5 + $0x18] sm:$0xf]  ;;  %v1560_v37 = vld [vmem:[#allocation5 + $0x20] sm:$0xf0] }
  0x40   : > { %v1447_v35 = vor.u32 %v1562_v32, %v1444_v33  ;;  %v1559_v38 = vld [vmem:[#allocation5 + $0x1c] sm:$0xf]  ;;  %v1432_v39 = vld [vmem:[#allocation5 + $0x24] sm:$0xf0]  ;;  %v1431_v40 = vor.u32 %v1560_v37, %v1430_v36  ;;  %v1418_v42 = vld [vmem:[#allocation5] sm:$0xf] }
  0x41   : > { %v1435_v41 = vor.u32 %v1559_v38, %v1432_v39  ;;  %v1557_v43 = vld [vmem:[#allocation5 + $0x8] sm:$0xf0]  ;;  %v1556_v44 = vld [vmem:[#allocation5 + $0x4] sm:$0xf]  ;;  %v1420_v45 = vld [vmem:[#allocation5 + $0xc] sm:$0xf0] }
  0x42   : > { %462 = vmatpush.bf16.msra.mxu0 %v1479_v16  ;;  %v1419_v46 = vor.u32 %v1557_v43, %v1418_v42  ;;  %v1423_v47 = vor.u32 %v1556_v44, %v1420_v45  ;;  %v291_v48 = vld [vmem:[%s2040_s28] sm:$0xf]  ;;  %v1510_v49 = vld [vmem:[#allocation5 + $0xb0] sm:$0xf]  ;;  %v1576_v53 = vld [vmem:[#allocation5 + $0xa0] sm:$0xf0] }
  0x43   : > { %475 = vmatpush.bf16.msra.mxu1 %v1483_v17  ;;  %v1579_v50 = vld [vmem:[#allocation5 + $0xb8] sm:$0xf0]  ;;  %v1498_v52 = vld [vmem:[#allocation5 + $0x98] sm:$0xf]  ;;  %v1486_v54 = vld [vmem:[#allocation5 + $0x80] sm:$0xf] }
  0x44   : > { %v1511_v51 = vor.u32 %v1579_v50, %v1510_v49  ;;  %v1499_v55 = vor.u32 %v1576_v53, %v1498_v52  ;;  %v1573_v56 = vld [vmem:[#allocation5 + $0x88] sm:$0xf0]  ;;  %v1474_v58 = vld [vmem:[#allocation5 + $0x68] sm:$0xf]  ;;  %v1570_v59 = vld [vmem:[#allocation5 + $0x70] sm:$0xf0] }
  0x45   : > { %v1487_v57 = vor.u32 %v1573_v56, %v1486_v54  ;;  %v1475_v60 = vor.u32 %v1570_v59, %v1474_v58  ;;  %v1462_v61 = vld [vmem:[#allocation5 + $0x50] sm:$0xf]  ;;  %v1567_v62 = vld [vmem:[#allocation5 + $0x58] sm:$0xf0]  ;;  %v2055_v0 = vld [vmem:[#allocation7] sm:$0x7] }
  0x46   : > { %463 = vmatpush.bf16.msra.mxu0 %v1467_v22  ;;  %486 = vmatpush.bf16.msra.mxu2 %v1511_v51  ;;  %v1463_v63 = vor.u32 %v1567_v62, %v1462_v61  ;;  %v1450_v1 = vld [vmem:[#allocation5 + $0x38] sm:$0xf]  ;;  %v1564_v2 = vld [vmem:[#allocation5 + $0x40] sm:$0xf0]  ;;  %v326_v3 = vperm.slane %v2055_v0, 0  ;;  %v327_v5 = vperm.slane %v2055_v0, 1 }
  0x47   : > { %476 = vmatpush.bf16.msra.mxu1 %v1471_v23  ;;  %v1451_v4 = vor.u32 %v1564_v2, %v1450_v1  ;;  %v1438_v6 = vld [vmem:[#allocation5 + $0x20] sm:$0xf]  ;;  %v1561_v7 = vld [vmem:[#allocation5 + $0x28] sm:$0xf0]  ;;  %v1426_v13 = vld [vmem:[#allocation5 + $0x8] sm:$0xf] }
  0x48   : > { %v1439_v11 = vor.u32 %v1561_v7, %v1438_v6  ;;  %v1558_v14 = vld [vmem:[#allocation5 + $0x10] sm:$0xf0]  ;;  %s1894_s26 = smov 32   ;;  %s1895_s30 = smov 96   ;;  %v1897_v19 = vmov 1983009808  }
  0x49   : > { %v1427_v16 = vor.u32 %v1558_v14, %v1426_v13  ;;  %s1896_s14 = smov 64   ;;  %v522_v20 = vunpack.c.l.s4 %v1897_v19  ;;  %v1898_v32 = vmov 1934713408   ;;  %vm531_vm0 = vcmask 1047556   ;;  %s1553_s16 = sshll.u32 %s1953_s25, 3 }
  0x4a   : > { %464 = vmatpush.bf16.msra.mxu0 %v1455_v28  ;;  %487 = vmatpush.bf16.msra.mxu2 %v1499_v55  ;;  %v536_v33 = vunpack.c.l.s4 %v1898_v32  ;;  %vm862_vm1 = vcmask 261120   ;;  %vm939_vm2 = vcmask 64512   ;;  %vm991_vm3 = vcmask 1043456   ;;  %s1415_s17 = sshll.u32 %s2036_s7, 3  ;;  %s1298_s27 = scalar_lea.hbm %s2283_s5, %s1553_s16 }
  0x4b   : > { %477 = vmatpush.bf16.msra.mxu1 %v1459_v29  ;;  %v2062_v24 = vunpack.c.0.s8 %v522_v20  ;;  %vm1198_vm4 = vcmask 523264   ;;  %vm1201_vm5 = vcmask 785408   ;;  %s289_s11 = scalar_lea.vmem [#allocation10], %s1415_s17  ;;  %s1302_s13 = sshll.u32 %s1298_s27, 4  ;;  %s1303_s13 = int_to_ptr.hbm [resolvable:$true] %s1302_s13 }
  0x4c   : > { %v2066_v39 = vunpack.c.0.s8 %v536_v33  ;;  %s1300_s12 = sshll.u32 %s289_s11, 4  ;;  %s1288_s15 = scalar_lea.sflag [#allocation4], %s2036_s7  ;;  %s1301_s12 = int_to_ptr.vmem [resolvable:$true] %s1300_s12 }
  0x4d   : > { %s1825_s25 = sshra.s32 %s1303_s13, 4  ;;  %s1826_s25 = int_to_ptr.hbm [resolvable:$true] %s1825_s25 }
  0x4e   : > { %465 = vmatpush.bf16.msra.mxu0 %v1443_v34  ;;  %488 = vmatpush.bf16.msra.mxu2 %v1487_v57  ;;  %s1827_s28 = scalar_lea.hbm %s1826_s25, 8  ;;  %p1832_p12 = scmp.lt.s32.totalorder %s1826_s25, %s2283_s5 }
  0x4f   : > { %478 = vmatpush.bf16.msra.mxu1 %v1447_v35  ;;  %p1828_p1 = scmp.ne.s32.totalorder %s1826_s25, %s1827_s28 }
  0x51   : > { %p1829_p3 = pnand %p1828_p1, %p2005_p13 }
  0x52   : > { %466 = vmatpush.bf16.msra.mxu0 %v1431_v40  ;;  %489 = vmatpush.bf16.msra.mxu2 %v1475_v60 }
  0x53   : > { %479 = vmatpush.bf16.msra.mxu1 %v1435_v41  ;;  %p1830_p5 = pneg %p1829_p3 }
  0x56   : > { %467 = vmatpush.bf16.msra.mxu0 %v1419_v46  ;;  %490 = vmatpush.bf16.msra.mxu2 %v1463_v63 }
  0x57   : > { %480 = vmatpush.bf16.msra.mxu1 %v1423_v47 }
  0x59   : > { %468 = vmatmul.bf16.vlgmr.msra.gmra.mxu0 %v291_v48 }
  0x5a   : > { %481 = vmatmul.bf16.vlgmr.msra.gmra.mxu1 %v291_v48  ;;  %491 = vmatpush.bf16.msra.mxu2 %v1451_v4 }
  0x5e   : > { %492 = vmatpush.bf16.msra.mxu2 %v1439_v11 }
  0x62   : > { %493 = vmatpush.bf16.msra.mxu2 %v1427_v16 }
  0x65   : > { %494 = vmatmul.bf16.vlgmr.msra.gmra.mxu2 %v291_v48 }
  0xd6   : > { %v469_v8 = vpop.f32.mrf.mxu0 }
  0xd7   : > { %v470_v9 = vadd.f32 %v469_v8, %v326_v3  ;;  %v482_v10 = vpop.f32.mrf.mxu1 }
  0xd8   : > { %v483_v12 = vadd.f32 %v482_v10, %v327_v5 }
  0xda   : > { %v499_v15 = vpack.c.bf16 %v483_v12, %v470_v9 }
  0xdc   : > { %506 = vrot.lane.b32.xlu1 %v499_v15, %s1894_s26  ;;  %502 = vrot.lane.b32.xlu0 %v499_v15, %s1895_s30  ;;  %v623_v22 = vrot.slane %v499_v15, 4  ;;  %v511_v26 = vshrl.u32 %v499_v15, 16 }
  0xde   : > { %v471_v17 = vpop.f32.mrf.mxu0  ;;  %v630_v30 = vshrl.u32 %v623_v22, 16 }
  0xdf   : > { %v484_v18 = vpop.f32.mrf.mxu1 }
  0xe4   : > { %504 = vrot.lane.b32.xlu0 %v499_v15, %s1896_s14 }
  0xe8   : > { %v495_v33 = vpop.f32.mrf.mxu2 }
 0x14e   : > { %v503_v21 = vpop.permute.xlu0 %502  ;;  %v507_v28 = vpop.permute.xlu1 %506 }
 0x14f   : > { %v512_v23 = vshrl.u32 %v503_v21, 16  ;;  %v510_v25 = vpack.i.b16 %v503_v21, %v499_v15  ;;  %v624_v27 = vrot.slane %v503_v21, 4  ;;  %v626_v34 = vrot.slane %v507_v28, 4 }
 0x150   : > { %v518_v41 = vshrl.u32 %v507_v28, 16 }
 0x151   : > { %v513_v29 = vpack.i.b16 %v512_v23, %v511_v26  ;;  %v631_v31 = vshrl.u32 %v624_v27, 16  ;;  %v524_v35 = vperm.slane %v510_v25, %v2062_v24  ;;  %v629_v36 = vpack.i.b16 %v624_v27, %v623_v22 }
 0x152   : > { %v637_v45 = vshrl.u32 %v626_v34, 16 }
 0x153   : > { %v632_v37 = vpack.i.b16 %v631_v31, %v630_v30  ;;  %v551_v38 = vperm.slane %v513_v29, %v2062_v24  ;;  %v533_v46 = vrot.slane %v524_v35, 4  ;;  %v643_v47 = vperm.slane %v629_v36, %v2062_v24 }
 0x155   : > { %v669_v48 = vperm.slane %v632_v37, %v2062_v24  ;;  %v559_v53 = vrot.slane %v551_v38, 4  ;;  %v651_v58 = vrot.slane %v643_v47, 4 }
 0x156   : > { %v505_v40 = vpop.permute.xlu0 %504 }
 0x157   : > { %v516_v42 = vpack.i.b16 %v507_v28, %v505_v40  ;;  %v517_v43 = vshrl.u32 %v505_v40, 16  ;;  %v625_v44 = vrot.slane %v505_v40, 4  ;;  %v677_v59 = vrot.slane %v669_v48, 4 }
 0x159   : > { %v519_v49 = vpack.i.b16 %v518_v41, %v517_v43  ;;  %v529_v50 = vperm.slane %v516_v42, %v2062_v24  ;;  %v635_v51 = vpack.i.b16 %v626_v34, %v625_v44  ;;  %v636_v52 = vshrl.u32 %v625_v44, 16 }
 0x15b   : > { %v530_v54 = vrot.slane %v529_v50, 4  ;;  %v534_v55 = vsel %vm531_vm0, %v529_v50, %v533_v46  ;;  %v556_v56 = vperm.slane %v519_v49, %v2062_v24  ;;  %v638_v57 = vpack.i.b16 %v637_v45, %v636_v52 }
 0x15c   : > { %v542_v60 = vperm.slane %v534_v55, %v2066_v39  ;;  %v648_v61 = vperm.slane %v635_v51, %v2062_v24  ;;  %v328_v52 = vperm.slane %v2055_v0, 2 }
 0x15d   : > { %v532_v62 = vsel %vm531_vm0, %v530_v54, %v524_v35  ;;  %v557_v63 = vrot.slane %v556_v56, 4  ;;  %v560_v1 = vsel %vm531_vm0, %v556_v56, %v559_v53  ;;  %v674_v2 = vperm.slane %v638_v57, %v2062_v24 }
 0x15e   : > { %v538_v3 = vperm.slane %v532_v62, %v2066_v39  ;;  %v545_v4 = vrot.slane %v542_v60, 4  ;;  %v568_v5 = vperm.slane %v560_v1, %v2066_v39  ;;  %v649_v6 = vrot.slane %v648_v61, 4 }
 0x15f   : > { %v558_v7 = vsel %vm531_vm0, %v557_v63, %v551_v38  ;;  %v652_v8 = vsel %vm531_vm0, %v648_v61, %v651_v58  ;;  %v675_v9 = vrot.slane %v674_v2, 4  ;;  %v678_v10 = vsel %vm531_vm0, %v674_v2, %v677_v59  ;;  %v497_v63 = vpop.f32.mrf.mxu2 }
 0x160   : > { %v543_v11 = vrot.slane %v538_v3, 4  ;;  %v546_v12 = vsel %vm531_vm0, 0, %v545_v4  ;;  %v564_v13 = vperm.slane %v558_v7, %v2066_v39  ;;  %v571_v14 = vrot.slane %v568_v5, 4 }
 0x161   : > { %v578_v15 = vrot.slane %v546_v12, 4  ;;  %v650_v16 = vsel %vm531_vm0, %v649_v6, %v643_v47  ;;  %v660_v17 = vperm.slane %v652_v8, %v2066_v39  ;;  %v676_v18 = vsel %vm531_vm0, %v675_v9, %v669_v48 }
 0x162   : > { %v544_v19 = vsel %vm531_vm0, 0, %v543_v11  ;;  %v569_v20 = vrot.slane %v564_v13, 4  ;;  %v572_v21 = vsel %vm531_vm0, 0, %v571_v14  ;;  %v656_v22 = vperm.slane %v650_v16, %v2066_v39 }
 0x163   : > { %v663_v23 = vrot.slane %v660_v17, 4  ;;  %v682_v25 = vperm.slane %v676_v18, %v2066_v39  ;;  %v686_v26 = vperm.slane %v678_v10, %v2066_v39  ;;  %v579_v28 = vsel %vm531_vm0, %v578_v15, %v544_v19 }
 0x164   : > { %v661_v27 = vrot.slane %v656_v22, 4  ;;  %v597_v29 = vrot.slane %v572_v21, 4  ;;  %v570_v36 = vsel %vm531_vm0, 0, %v569_v20  ;;  %v583_v40 = vperm.slane %v579_v28, %v2062_v24 }
 0x165   : > { %v664_v30 = vsel %vm531_vm0, 0, %v663_v23  ;;  %v689_v31 = vrot.slane %v686_v26, 4  ;;  %v687_v32 = vrot.slane %v682_v25, 4  ;;  %v691_v41 = vsel %vm531_vm0, %v663_v23, %v656_v22 }
 0x166   : > { %v696_v34 = vrot.slane %v664_v30, 4  ;;  %v662_v35 = vsel %vm531_vm0, 0, %v661_v27  ;;  %v573_v44 = vsel %vm531_vm0, %v545_v4, %v538_v3  ;;  %v592_v47 = vsel %vm531_vm0, %v571_v14, %v564_v13 }
 0x167   : > { %v690_v37 = vsel %vm531_vm0, 0, %v689_v31  ;;  %v688_v38 = vsel %vm531_vm0, 0, %v687_v32  ;;  %v710_v46 = vsel %vm531_vm0, %v689_v31, %v682_v25  ;;  %v598_v48 = vsel %vm531_vm0, %v597_v29, %v570_v36 }
 0x168   : > { %v697_v42 = vsel %vm531_vm0, %v696_v34, %v662_v35  ;;  %v715_v43 = vrot.slane %v690_v37, 4  ;;  %v584_v50 = vrot.slane %v583_v40, 4  ;;  %v602_v51 = vperm.slane %v598_v48, %v2062_v24 }
 0x169   : > { %v701_v45 = vperm.slane %v697_v42, %v2062_v24  ;;  %v695_v53 = vperm.slane %v691_v41, %v2062_v24  ;;  %v577_v56 = vperm.slane %v573_v44, %v2062_v24  ;;  %v596_v57 = vperm.slane %v592_v47, %v2062_v24 }
 0x16a   : > { %v716_v49 = vsel %vm531_vm0, %v715_v43, %v688_v38  ;;  %v603_v58 = vrot.slane %v602_v51, 4  ;;  %v496_v59 = vadd.f32 %v495_v33, %v328_v52  ;;  %v714_v61 = vperm.slane %v710_v46, %v2062_v24 }
 0x16b   : > { %v702_v54 = vrot.slane %v701_v45, 4  ;;  %v720_v55 = vperm.slane %v716_v49, %v2062_v24  ;;  %v585_v0 = vsel %vm531_vm0, %v584_v50, %v577_v56 }
 0x16c   : > { %v604_v2 = vsel %vm531_vm0, %v603_v58, %v596_v57  ;;  %v2119_v3 = vpack.c.bf16 %v496_v59, %v496_v59  ;;  %v589_v9 = vperm.slane %v585_v0, %v2066_v39 }
 0x16d   : > { %v703_v60 = vsel %vm531_vm0, %v702_v54, %v695_v53  ;;  %v721_v62 = vrot.slane %v720_v55, 4  ;;  %v608_v7 = vperm.slane %v604_v2, %v2066_v39 }
 0x16e   : > { %v707_v1 = vperm.slane %v703_v60, %v2066_v39  ;;  %742 = vrot.lane.b32.xlu2 %v2119_v3, %s1895_s30  ;;  %v590_v21 = vrot.slane %v589_v9, 4  ;;  %v614_v34 = vshrl.u32 %v589_v9, 16 }
 0x16f   : > { %v722_v4 = vsel %vm531_vm0, %v721_v62, %v714_v61  ;;  %v609_v17 = vrot.slane %v608_v7, 4  ;;  %v613_v27 = vpack.i.b16 %v608_v7, %v589_v9  ;;  %v615_v33 = vshrl.u32 %v608_v7, 16 }
 0x170   : > { %v726_v5 = vperm.slane %v722_v4, %v2066_v39  ;;  %v708_v6 = vrot.slane %v707_v1, 4  ;;  %v732_v8 = vshrl.u32 %v707_v1, 16  ;;  %v591_v28 = vsel %vm531_vm0, 0, %v590_v21 }
 0x171   : > { %v610_v25 = vsel %vm531_vm0, 0, %v609_v17  ;;  %v620_v31 = vshrl.u32 %v591_v28, 16  ;;  %v616_v35 = vpack.i.b16 %v615_v33, %v614_v34 }
 0x172   : > { %v731_v10 = vpack.i.b16 %v726_v5, %v707_v1  ;;  %v733_v11 = vshrl.u32 %v726_v5, 16  ;;  %v709_v12 = vsel %vm531_vm0, 0, %v708_v6  ;;  %v727_v13 = vrot.slane %v726_v5, 4 }
 0x173   : > { %v738_v18 = vshrl.u32 %v709_v12, 16  ;;  %v621_v29 = vshrl.u32 %v610_v25, 16  ;;  %v619_v36 = vpack.i.b16 %v610_v25, %v591_v28  ;;  %v751_v5 = vshrl.u32 %v2119_v3, 16 }
 0x174   : > { %v867_v14 = vsel %vm862_vm1, %v731_v10, 0  ;;  %v734_v15 = vpack.i.b16 %v733_v11, %v732_v8  ;;  %v728_v16 = vsel %vm531_vm0, 0, %v727_v13 }
 0x175   : > { %876 = vmatpush.bf16.xpose.msra.mxu3 %v867_v14  ;;  %v739_v19 = vshrl.u32 %v728_v16, 16  ;;  %v737_v23 = vpack.i.b16 %v728_v16, %v709_v12  ;;  %v622_v32 = vpack.i.b16 %v621_v29, %v620_v31 }
 0x176   : > { %v886_v20 = vsel %vm862_vm1, %v734_v15, 0  ;;  %744 = vrot.lane.b32.xlu2 %v2119_v3, %s1896_s14 }
 0x177   : > { %v740_v22 = vpack.i.b16 %v739_v19, %v738_v18  ;;  %v905_v30 = vsel %vm862_vm1, %v737_v23, 0 }
 0x179   : > { %v924_v26 = vsel %vm862_vm1, %v740_v22, 0 }
 0x17a   : > { %933 = vmatpush.bf16.xpose.msrb.mxu0 %v924_v26 }
 0x17c   : > { %1512 = vmatmul.msk.bf16.vlgmr.msra.gmra.mxu3 %vm862_vm1, %v613_v27 }
 0x17d   : > { %895 = vmatpush.bf16.xpose.msrb.mxu3 %v886_v20 }
 0x181   : > { %1515 = vmatmul.msk.bf16.vlgmr.msrb.gmra.mxu0 %vm862_vm1, %v622_v32 }
 0x185   : > { %914 = vmatpush.bf16.xpose.msra.mxu3 %v905_v30 }
 0x18c   : > { %1513 = vmatmul.msk.bf16.vlgmr.msrb.gmra.mxu3 %vm862_vm1, %v616_v35 }
 0x19c   : > { %1514 = vmatmul.msk.bf16.vlgmr.msra.gmra.mxu3 %vm862_vm1, %v619_v36 }
 0x1c8   : > { %v743_v50 = vpop.permute.xlu2 %742 }
 0x1c9   : > { %v752_v6 = vshrl.u32 %v743_v50, 16  ;;  %v750_v8 = vpack.i.b16 %v743_v50, %v2119_v3 }
 0x1cb   : > { %v753_v10 = vpack.i.b16 %v752_v6, %v751_v5  ;;  %v764_v11 = vperm.slane %v750_v8, %v2062_v24 }
 0x1cd   : > { %v790_v13 = vperm.slane %v753_v10, %v2062_v24  ;;  %v772_v18 = vrot.slane %v764_v11, 4 }
 0x1cf   : > { %v798_v21 = vrot.slane %v790_v13, 4 }
 0x1d0   : > { %v745_v57 = vpop.permute.xlu2 %744 }
 0x1d1   : > { %v757_v14 = vshrl.u32 %v745_v57, 16 }
 0x1fe   : > { %v935_v37 = vpop.f32.mrf.mxu0 }
 0x1ff   : > { %v878_v38 = vpop.f32.mrf.mxu3  ;;  %v949_v40 = vsel %vm939_vm2, %v935_v37, -inf }
 0x200   : > { %950 = vmax.xlane.f32.xlu0 %v949_v40  ;;  %v940_v41 = vsel %vm939_vm2, %v878_v38, -inf }
 0x201   : > { %941 = vmax.xlane.f32.xlu1 %v940_v41 }
 0x206   : > { %v937_v42 = vpop.f32.mrf.mxu0 }
 0x207   : > { %v880_v43 = vpop.f32.mrf.mxu3 }
 0x20f   : > { %v897_v44 = vpop.f32.mrf.mxu3 }
 0x210   : > { %v943_v45 = vsel %vm939_vm2, %v897_v44, -inf }
 0x211   : > { %944 = vmax.xlane.f32.xlu2 %v943_v45 }
 0x217   : > { %v899_v46 = vpop.f32.mrf.mxu3 }
 0x21f   : > { %v916_v47 = vpop.f32.mrf.mxu3 }
 0x220   : > { %v946_v48 = vsel %vm939_vm2, %v916_v47, -inf }
 0x221   : > { %947 = vmax.xlane.f32.xlu2 %v946_v48 }
 0x227   : > { %v918_v49 = vpop.f32.mrf.mxu3 }
 0x239   : > { %746 = vrot.lane.b32.xlu2 %v2119_v3, %s1894_s26 }
 0x273   : > { %v951_v51 = vpop.xlane.xlu0 %950 }
 0x274   : > { %v942_v52 = vpop.xlane.xlu1 %941  ;;  %v955_v54 = vsub.f32 %v935_v37, %v951_v51 }
 0x275   : > { %v952_v53 = vsub.f32 %v878_v38, %v942_v52 }
 0x276   : > { %v962_v56 = vmul.f32 1.442695, %v955_v54 }
 0x277   : > { %v956_v55 = vmul.f32 1.442695, %v952_v53 }
 0x279   : > { %1675 = vpow2.f32 %v956_v55 }
 0x27a   : > { %1677 = vpow2.f32 %v962_v56 }
 0x27f   : > { %v2147_v58 = vpop.eup %1675 }
 0x280   : > { %v964_v59 = vsel %vm939_vm2, %v2147_v58, 0.0  ;;  %v2151_v61 = vpop.eup %1677 }
 0x281   : > { %965 = vadd.xlane.f32.xlu1 %v964_v59  ;;  %v973_v1 = vsel %vm939_vm2, %v2151_v61, 0.0 }
 0x284   : > { %v945_v60 = vpop.xlane.xlu2 %944 }
 0x285   : > { %v953_v62 = vsub.f32 %v897_v44, %v945_v60 }
 0x287   : > { %v958_v63 = vmul.f32 1.442695, %v953_v62 }
 0x289   : > { %1679 = vpow2.f32 %v958_v63  ;;  %974 = vadd.xlane.f32.xlu1 %v973_v1 }
 0x28f   : > { %v2155_v0 = vpop.eup %1679 }
 0x290   : > { %v967_v2 = vsel %vm939_vm2, %v2155_v0, 0.0 }
 0x291   : > { %968 = vadd.xlane.f32.xlu2 %v967_v2 }
 0x294   : > { %v948_v4 = vpop.xlane.xlu2 %947 }
 0x295   : > { %v954_v7 = vsub.f32 %v916_v47, %v948_v4 }
 0x297   : > { %v960_v9 = vmul.f32 1.442695, %v954_v7 }
 0x299   : > { %1681 = vpow2.f32 %v960_v9 }
 0x29c   : > { %v747_v12 = vpop.permute.xlu2 %746 }
 0x29d   : > { %v756_v15 = vpack.i.b16 %v747_v12, %v745_v57  ;;  %v758_v16 = vshrl.u32 %v747_v12, 16 }
 0x29f   : > { %v2163_v17 = vpop.eup %1681  ;;  %v759_v19 = vpack.i.b16 %v758_v16, %v757_v14  ;;  %v769_v20 = vperm.slane %v756_v15, %v2062_v24 }
 0x2a0   : > { %v970_v3 = vsel %vm939_vm2, %v2163_v17, 0.0 }
 0x2a1   : > { %v770_v22 = vrot.slane %v769_v20, 4  ;;  %v773_v23 = vsel %vm531_vm0, %v769_v20, %v772_v18  ;;  %v795_v25 = vperm.slane %v759_v19, %v2062_v24  ;;  %971 = vadd.xlane.f32.xlu0 %v970_v3 }
 0x2a2   : > { %v781_v26 = vperm.slane %v773_v23, %v2066_v39 }
 0x2a3   : > { %v771_v27 = vsel %vm531_vm0, %v770_v22, %v764_v11  ;;  %v796_v28 = vrot.slane %v795_v25, 4  ;;  %v799_v29 = vsel %vm531_vm0, %v795_v25, %v798_v21 }
 0x2a4   : > { %v777_v30 = vperm.slane %v771_v27, %v2066_v39  ;;  %v784_v31 = vrot.slane %v781_v26, 4  ;;  %v807_v32 = vperm.slane %v799_v29, %v2066_v39 }
 0x2a5   : > { %v797_v33 = vsel %vm531_vm0, %v796_v28, %v790_v13 }
 0x2a6   : > { %v782_v34 = vrot.slane %v777_v30, 4  ;;  %v785_v35 = vsel %vm531_vm0, 0, %v784_v31  ;;  %v803_v36 = vperm.slane %v797_v33, %v2066_v39  ;;  %v810_v37 = vrot.slane %v807_v32, 4 }
 0x2a7   : > { %v817_v38 = vrot.slane %v785_v35, 4  ;;  %v812_v44 = vsel %vm531_vm0, %v784_v31, %v777_v30 }
 0x2a8   : > { %v783_v40 = vsel %vm531_vm0, 0, %v782_v34  ;;  %v808_v41 = vrot.slane %v803_v36, 4  ;;  %v811_v42 = vsel %vm531_vm0, 0, %v810_v37  ;;  %v831_v48 = vsel %vm531_vm0, %v810_v37, %v803_v36 }
 0x2a9   : > { %v836_v43 = vrot.slane %v811_v42, 4  ;;  %v818_v45 = vsel %vm531_vm0, %v817_v38, %v783_v40  ;;  %v816_v50 = vperm.slane %v812_v44, %v2062_v24  ;;  %v835_v54 = vperm.slane %v831_v48, %v2062_v24 }
 0x2aa   : > { %v809_v46 = vsel %vm531_vm0, 0, %v808_v41  ;;  %v822_v47 = vperm.slane %v818_v45, %v2062_v24 }
 0x2ab   : > { %v837_v49 = vsel %vm531_vm0, %v836_v43, %v809_v46 }
 0x2ac   : > { %v823_v51 = vrot.slane %v822_v47, 4  ;;  %v841_v52 = vperm.slane %v837_v49, %v2062_v24 }
 0x2ae   : > { %v824_v53 = vsel %vm531_vm0, %v823_v51, %v816_v50  ;;  %v842_v55 = vrot.slane %v841_v52, 4 }
 0x2af   : > { %v828_v56 = vperm.slane %v824_v53, %v2066_v39 }
 0x2b0   : > { %v843_v57 = vsel %vm531_vm0, %v842_v55, %v835_v54 }
 0x2b1   : > { %v847_v59 = vperm.slane %v843_v57, %v2066_v39  ;;  %v829_v60 = vrot.slane %v828_v56, 4  ;;  %v853_v62 = vshrl.u32 %v828_v56, 16 }
 0x2b3   : > { %v852_v63 = vpack.i.b16 %v847_v59, %v828_v56  ;;  %v854_v1 = vshrl.u32 %v847_v59, 16  ;;  %v830_v2 = vsel %vm531_vm0, 0, %v829_v60  ;;  %v848_v4 = vrot.slane %v847_v59, 4 }
 0x2b4   : > { %v859_v9 = vshrl.u32 %v830_v2, 16 }
 0x2b5   : > { %v993_v5 = vsel %vm991_vm3, %v852_v63, 0  ;;  %v855_v6 = vpack.i.b16 %v854_v1, %v853_v62  ;;  %v849_v7 = vsel %vm531_vm0, 0, %v848_v4  ;;  %v1587_v63 = vld [vmem:[#allocation8 + $0x38] sm:$0xff] }
 0x2b6   : > { %1002 = vmatpush.bf16.msrb.mxu2 %v993_v5  ;;  %v858_v8 = vpack.i.b16 %v849_v7, %v830_v2  ;;  %v860_v10 = vshrl.u32 %v849_v7, 16  ;;  %1273 = vmatpush.bf16.msrb.mxu1 %v1587_v63 }
 0x2b7   : > { %v1012_v11 = vsel %vm991_vm3, %v855_v6, 0  ;;  %v1586_v6 = vld [vmem:[#allocation8 + $0x30] sm:$0xff] }
 0x2b8   : > { %v1031_v12 = vsel %vm991_vm3, %v858_v8, 0  ;;  %v861_v13 = vpack.i.b16 %v860_v10, %v859_v9 }
 0x2b9   : > { %1040 = vmatpush.bf16.msrb.mxu3 %v1031_v12 }
 0x2ba   : > { %1021 = vmatpush.bf16.msra.mxu2 %v1012_v11  ;;  %v1050_v14 = vsel %vm991_vm3, %v861_v13, 0  ;;  %1274 = vmatpush.bf16.msrb.mxu1 %v1586_v6 }
 0x2bb   : > { %1059 = vmatpush.bf16.msra.mxu0 %v1050_v14 }
 0x2f4   : > { %v966_v15 = vpop.xlane.xlu1 %965 }
 0x2f5   : > { %1683 = vrcp.f32 %v966_v15 }
 0x2fb   : > { %v1684_v16 = vpop.eup %1683 }
 0x2fc   : > { %v980_v18 = vmul.f32 %v1684_v16, %v2147_v58  ;;  %v975_v19 = vpop.xlane.xlu1 %974 }
 0x2fd   : > { %1685 = vrcp.f32 %v975_v19  ;;  %v1585_v19 = vld [vmem:[#allocation8 + $0x28] sm:$0xff] }
 0x2fe   : > { %v984_v20 = vpack.c.bf16 %v980_v18, %v980_v18  ;;  %1275 = vmatpush.bf16.msrb.mxu1 %v1585_v19 }
 0x300   : > { %1516 = vmatmul.msk.bf16.vlgmr.msrb.gmra.mxu2 %vm939_vm2, %v984_v20 }
 0x303   : > { %v1686_v3 = vpop.eup %1685 }
 0x304   : > { %v983_v21 = vmul.f32 %v1686_v3, %v2151_v61  ;;  %v969_v22 = vpop.xlane.xlu2 %968 }
 0x305   : > { %1687 = vrcp.f32 %v969_v22 }
 0x306   : > { %v987_v23 = vpack.c.bf16 %v983_v21, %v983_v21 }
 0x308   : > { %1519 = vmatmul.msk.bf16.vlgmr.msra.gmra.mxu0 %vm939_vm2, %v987_v23 }
 0x30b   : > { %v1688_v25 = vpop.eup %1687 }
 0x30c   : > { %v981_v26 = vmul.f32 %v1688_v25, %v2155_v0 }
 0x30e   : > { %v985_v27 = vpack.c.bf16 %v981_v26, %v981_v26 }
 0x310   : > { %1517 = vmatmul.msk.bf16.vlgmr.msra.gmra.mxu2 %vm939_vm2, %v985_v27  ;;  %v1584_v27 = vld [vmem:[#allocation8 + $0x20] sm:$0xff] }
 0x311   : > { %1276 = vmatpush.bf16.msrb.mxu1 %v1584_v27 }
 0x314   : > { %v972_v58 = vpop.xlane.xlu0 %971 }
 0x315   : > { %1689 = vrcp.f32 %v972_v58 }
 0x31b   : > { %v1690_v28 = vpop.eup %1689 }
 0x31c   : > { %v982_v29 = vmul.f32 %v1690_v28, %v2163_v17 }
 0x31e   : > { %v986_v30 = vpack.c.bf16 %v982_v29, %v982_v29 }
 0x320   : > { %1518 = vmatmul.msk.bf16.vlgmr.msrb.gmra.mxu3 %vm939_vm2, %v986_v30 }
 0x383   : > { %v1004_v61 = vpop.f32.mrf.mxu2 }
 0x384   : > { %v1065_v37 = vpack.c.bf16 %v1004_v61, %v1004_v61 }
 0x385   : > { %v1061_v31 = vpop.f32.mrf.mxu0 }
 0x386   : > { %v1072_v38 = vshrl.u32 %v1065_v37, 16  ;;  %v1068_v41 = vpack.c.bf16 %v1061_v31, %v1061_v31 }
 0x388   : > { %v1079_v45 = vshrl.u32 %v1068_v41, 16 }
 0x38b   : > { %v1006_v32 = vpop.f32.mrf.mxu2 }
 0x38d   : > { %v1063_v33 = vpop.f32.mrf.mxu0 }
 0x38e   : > { %v1583_v33 = vld [vmem:[#allocation8 + $0x18] sm:$0xff] }
 0x38f   : > { %1277 = vmatpush.bf16.msrb.mxu1 %v1583_v33 }
 0x393   : > { %v1023_v34 = vpop.f32.mrf.mxu2 }
 0x394   : > { %v1066_v35 = vpack.c.bf16 %v1023_v34, %v1023_v34 }
 0x396   : > { %v1073_v0 = vshrl.u32 %v1066_v35, 16  ;;  %v1071_v40 = vpack.i.b16 %v1066_v35, %v1065_v37 }
 0x398   : > { %v1074_v42 = vpack.i.b16 %v1073_v0, %v1072_v38  ;;  %v1085_v44 = vperm.slane %v1071_v40, %v2062_v24 }
 0x39a   : > { %v1111_v46 = vperm.slane %v1074_v42, %v2062_v24  ;;  %v1093_v49 = vrot.slane %v1085_v44, 4 }
 0x39b   : > { %v1025_v36 = vpop.f32.mrf.mxu2 }
 0x39c   : > { %v1119_v52 = vrot.slane %v1111_v46, 4 }
 0x3a3   : > { %v1042_v43 = vpop.f32.mrf.mxu3 }
 0x3a4   : > { %v1067_v17 = vpack.c.bf16 %v1042_v43, %v1042_v43 }
 0x3a6   : > { %v1077_v47 = vpack.i.b16 %v1068_v41, %v1067_v17  ;;  %v1078_v48 = vshrl.u32 %v1067_v17, 16 }
 0x3a8   : > { %v1080_v50 = vpack.i.b16 %v1079_v45, %v1078_v48  ;;  %v1090_v51 = vperm.slane %v1077_v47, %v2062_v24 }
 0x3aa   : > { %v1091_v53 = vrot.slane %v1090_v51, 4  ;;  %v1094_v54 = vsel %vm531_vm0, %v1090_v51, %v1093_v49  ;;  %v1116_v55 = vperm.slane %v1080_v50, %v2062_v24  ;;  %v1581_v49 = vld [vmem:[#allocation8 + $0x8] sm:$0xff]  ;;  %v1580_v50 = vld [vmem:[#allocation8] sm:$0xff] }
 0x3ab   : > { %v1102_v56 = vperm.slane %v1094_v54, %v2066_v39  ;;  %v1044_v57 = vpop.f32.mrf.mxu3 }
 0x3ac   : > { %v1092_v59 = vsel %vm531_vm0, %v1091_v53, %v1085_v44  ;;  %v1117_v60 = vrot.slane %v1116_v55, 4  ;;  %v1120_v62 = vsel %vm531_vm0, %v1116_v55, %v1119_v52  ;;  %v1674_v57 = vld [vmem:[%s2282_s4] ss:$0 sm:$0xff] }
 0x3ad   : > { %v1098_v1 = vperm.slane %v1092_v59, %v2066_v39  ;;  %v1105_v2 = vrot.slane %v1102_v56, 4  ;;  %v1128_v4 = vperm.slane %v1120_v62, %v2066_v39 }
 0x3ae   : > { %v1118_v5 = vsel %vm531_vm0, %v1117_v60, %v1111_v46 }
 0x3af   : > { %v1103_v7 = vrot.slane %v1098_v1, 4  ;;  %v1106_v8 = vsel %vm531_vm0, 0, %v1105_v2  ;;  %v1124_v9 = vperm.slane %v1118_v5, %v2066_v39  ;;  %v1131_v10 = vrot.slane %v1128_v4, 4 }
 0x3b0   : > { %v1138_v11 = vrot.slane %v1106_v8, 4  ;;  %v1133_v15 = vsel %vm531_vm0, %v1105_v2, %v1098_v1 }
 0x3b1   : > { %v1104_v12 = vsel %vm531_vm0, 0, %v1103_v7  ;;  %v1129_v13 = vrot.slane %v1124_v9, 4  ;;  %v1132_v14 = vsel %vm531_vm0, 0, %v1131_v10  ;;  %v1152_v21 = vsel %vm531_vm0, %v1131_v10, %v1124_v9 }
 0x3b2   : > { %v1139_v16 = vsel %vm531_vm0, %v1138_v11, %v1104_v12  ;;  %v1157_v18 = vrot.slane %v1132_v14, 4  ;;  %v1137_v23 = vperm.slane %v1133_v15, %v2062_v24  ;;  %v1156_v28 = vperm.slane %v1152_v21, %v2062_v24 }
 0x3b3   : > { %v1130_v20 = vsel %vm531_vm0, 0, %v1129_v13  ;;  %v1143_v3 = vperm.slane %v1139_v16, %v2062_v24 }
 0x3b4   : > { %v1158_v22 = vsel %vm531_vm0, %v1157_v18, %v1130_v20 }
 0x3b5   : > { %v1144_v25 = vrot.slane %v1143_v3, 4  ;;  %v1162_v26 = vperm.slane %v1158_v22, %v2062_v24  ;;  %v1582_v24 = vld [vmem:[#allocation8 + $0x10] sm:$0xff] }
 0x3b6   : > { %1278 = vmatpush.bf16.msrb.mxu1 %v1582_v24 }
 0x3b7   : > { %v1145_v58 = vsel %vm531_vm0, %v1144_v25, %v1137_v23  ;;  %v1163_v29 = vrot.slane %v1162_v26, 4 }
 0x3b8   : > { %v1149_v30 = vperm.slane %v1145_v58, %v2066_v39 }
 0x3b9   : > { %v1164_v61 = vsel %vm531_vm0, %v1163_v29, %v1156_v28 }
 0x3ba   : > { %v1168_v31 = vperm.slane %v1164_v61, %v2066_v39  ;;  %v1150_v32 = vrot.slane %v1149_v30, 4  ;;  %v1174_v34 = vshrl.u32 %v1149_v30, 16  ;;  %1279 = vmatpush.bf16.msrb.mxu1 %v1581_v49 }
 0x3bc   : > { %v1175_v35 = vshrl.u32 %v1168_v31, 16  ;;  %v1169_v36 = vrot.slane %v1168_v31, 4  ;;  %v1173_v37 = vpack.i.b16 %v1168_v31, %v1149_v30  ;;  %v1151_v0 = vsel %vm531_vm0, 0, %v1150_v32 }
 0x3bd   : > { %v1180_v44 = vshrl.u32 %v1151_v0, 16 }
 0x3be   : > { %v1176_v38 = vpack.i.b16 %v1175_v35, %v1174_v34  ;;  %v1170_v40 = vsel %vm531_vm0, 0, %v1169_v36  ;;  %1280 = vmatpush.bf16.msrb.mxu1 %v1580_v50 }
 0x3bf   : > { %v1179_v41 = vpack.i.b16 %v1170_v40, %v1151_v0  ;;  %v1181_v42 = vshrl.u32 %v1170_v40, 16 }
 0x3c0   : > { %v1183_v43 = vunpack.c.l.b16 %v1176_v38 }
 0x3c1   : > { %v1187_v17 = vunpack.c.l.b16 %v1179_v41  ;;  %v1182_v45 = vpack.i.b16 %v1181_v42, %v1180_v44 }
 0x3c2   : > { %v1184_v39 = vpack.c.b16 %v1183_v43, %v1183_v43 }
 0x3c3   : > { %v1188_v46 = vpack.c.b16 %v1187_v17, %v1187_v17  ;;  %v1191_v47 = vunpack.c.l.b16 %v1182_v45 }
 0x3c4   : > { %1185 = vrot.lane.b32.xlu0 %v1184_v39, %s1894_s26 }
 0x3c5   : > { %1189 = vrot.lane.b32.xlu1 %v1188_v46, %s1896_s14  ;;  %v1192_v48 = vpack.c.b16 %v1191_v47, %v1191_v47  ;;  %s1831_s14 = scalar_lea.hbm %s2283_s5, 16 }
 0x3c6   : > { %p1833_p8 = scmp.lt.s32.totalorder %s1831_s14, %s1827_s28 }
 0x3c8   : > { %p1834_p7 = por %p1833_p8, %p1832_p12 }
 0x3ca   : > { %p1835_p9 = pnand %p1834_p7, %p1830_p5 }
 0x3cc   : > { %1193 = vrot.lane.b32.xlu0 %v1192_v48, %s1895_s30 }
 0x436   : > { %v1186_v51 = vpop.permute.xlu0 %1185 }
 0x437   : > { %v1197_v52 = vsel %vm862_vm1, %v1173_v37, %v1186_v51  ;;  %v1190_v53 = vpop.permute.xlu1 %1189 }
 0x438   : > { %v1200_v54 = vsel %vm1198_vm4, %v1197_v52, %v1190_v53 }
 0x43e   : > { %v1194_v55 = vpop.permute.xlu0 %1193 }
 0x43f   : > { %v1203_v56 = vsel %vm1201_vm5, %v1200_v54, %v1194_v55 }
 0x440   : > { %1281 = vmatmul.bf16.vlgmr.msrb.gmra.mxu1 %v1203_v56 }
 0x4bd   : > { %v1282_v59 = vpop.f32.mrf.mxu1 }
 0x4be   : > { %v1283_v60 = vadd.f32 %v1674_v57, %v1282_v59 }
 0x4c0   : > { %1286 = vst [vmem:[%s289_s11] sm:$0xff] %v1283_v60 }
 0x4c1   : > { %1838 = shalt.err (!%p1835_p9)
}
 0x4c2   : > { %1602 = dma.vmem_to_hbm [thread:$0]  (%p2005_p13), %s1301_s12, 128, %s1303_s13, %s1288_s15  }
 0x4c5   : > { %v1284_v62 = vpop.f32.mrf.mxu1 }
 0x4c6 PF: > { %s1314_s7 = sand.u32 1, %s1873_s18   ;;  %p2290_p10 = scmp.ge.s32.totalorder %s1885_s21, 2 }
 0x4c7   : > { %s1315_s22 = scalar_lea.sflag [#allocation4], %s1314_s7 }
 0x4c8   : > { %p1619_p11 = pnand %p2290_p10, %p2010_p4 }
 0x4ca   : > { %p1620_p0 = pneg %p1619_p11 }
 0x4cc   : > { %1868 = dma.done.wait (%p1620_p0), %s1315_s22, 128  }
 0x4cd   : > { %1870 = vsyncadd (%p1620_p0), %s1315_s22, 4294967168  ;;  %p20_p2 = scmp.ge.s32.totalorder %s1985_s24, 4   ;;  %s2291_s18 = smov %s1877_s19 }
 0x4ce   : > { %s2292_s19 = smov %s1881_s20  ;;  %s2293_s20 = smov %s1997_s29 }
 0x4cf   : > { %s2294_s21 = smov %s1985_s24  ;;  %22 = sbr.rel (!%p20_p2) target bundleno = 7 (0x7), region = 97 }
 0x4d4   :  { %1321 = vsyncpa [#allocation3], 1 }
 0x4d5   :  { %1323 = vsyncpa [#allocation3 + $0x1], 1 }
 0x4d6   :  { %1324 = vsyncpa [#allocation6], 1 }
 0x4d7   :  { %1325 = vsyncpa [#allocation9], 1 }
 0x4d8   :  { %1326 = vsyncpa [#allocation4], 1 }
 0x4d9   :  { %1328 = vsyncpa [#allocation4 + $0x1], 1 }

// kernel: tpu_custom_call.1
= control target key start
LH: loop header
LB: loop body
LE: loop exit
PB: predicated region body
PF: predicated region fallthrough
CT: control target
= control target key end

     0   :  { %10 = vsyncpa [#allocation3], 0  ;;  %s2278_s0 = inlined_call_operand.hbm [shape: bf16[2,8,128], index: 0, kind: input, shape index: {}]   ;;  %s2279_s1 = inlined_call_operand.hbm [shape: bf16[128,384], index: 1, kind: input, shape index: {}]   ;;  %s2280_s2 = inlined_call_operand.hbm [shape: f32[1,384], index: 2, kind: input, shape index: {}]   ;;  %s2281_s3 = inlined_call_operand.hbm [shape: bf16[128,128], index: 3, kind: input, shape index: {}]   ;;  %s2282_s4 = inlined_call_operand.vmem [shape: f32[1,128], index: 4, kind: input, shape index: {}]   ;;  %s2283_s5 = inlined_call_operand.hbm [shape: f32[2,8,128], index: 5, kind: output, shape index: {}]  }
   0x1   :  { %12 = vsyncpa [#allocation3 + $0x1], 0 }
   0x2   :  { %13 = vsyncpa [#allocation6], 0 }
   0x3   :  { %14 = vsyncpa [#allocation9], 0 }
   0x4   :  { %15 = vsyncpa [#allocation4], 0 }
   0x5   :  { %17 = vsyncpa [#allocation4 + $0x1], 0  ;;  %s1929_s18 = smov 0   ;;  %s1931_s19 = smov 0  }
   0x6   :  { %s1933_s20 = smov 0   ;;  %s1935_s21 = smov 0  }
   0x7 LB: > { %s175_s24 = sshll.u32 %s2279_s1, 4  ;;  %s1953_s25 = sadd.s32 4294967295, %s1885_s21   ;;  %s1885_s21 = sphi %s1935_s21, %s2294_s21   ;;  %s1881_s20 = sphi %s1933_s20, %s2293_s20   ;;  %s1877_s19 = sphi %s1931_s19, %s2292_s19   ;;  %s1873_s18 = sphi %s1929_s18, %s2291_s18   ;;  %s176_s24 = int_to_ptr.hbm [resolvable:$true] %s175_s24 }
   0x8   : > { %p1403_p0 = scmp.ge.s32.totalorder %s1885_s21, 1  ;;  %p44_p1 = scmp.eq.s32.totalorder %s1953_s25, 0 }
   0x9   : > { %p164_p2 = scmp.lt.s32.totalorder %s1885_s21, 3  ;;  %s1887_s27 = smov [#allocation5]  }
   0xa   : > { %s177_s28 = sshll.u32 %s1887_s27, 4  ;;  %s190_s6 = sshll.u32 %s2280_s2, 4  ;;  %s178_s28 = int_to_ptr.vmem [resolvable:$true] %s177_s28  ;;  %s191_s6 = int_to_ptr.hbm [resolvable:$true] %s190_s6 }
   0xb   : > { %p1958_p3 = pnand %p1403_p0, %p164_p2  ;;  %s201_s10 = sshll.u32 %s2281_s3, 4  ;;  %s202_s10 = int_to_ptr.hbm [resolvable:$true] %s201_s10 }
   0xc   : > { %s1888_s11 = smov [#allocation7]   ;;  %s1889_s13 = smov 192  }
   0xd   : > { %p1604_p4 = pneg %p1958_p3  ;;  %s192_s12 = sshll.u32 %s1888_s11, 4  ;;  %s193_s12 = int_to_ptr.vmem [resolvable:$true] %s192_s12 }
   0xe   : > { %s1890_s14 = smov 12   ;;  %s1891_s15 = smov [#allocation8]  }
   0xf   : > { %p1970_p6 = pnand %p1604_p4, %p44_p1  ;;  %s203_s16 = sshll.u32 %s1891_s15, 4  ;;  %s204_s16 = int_to_ptr.vmem [resolvable:$true] %s203_s16 }
  0x10   : > { %s1892_s17 = smov 64   ;;  %s1893_s22 = smov 4  }
  0x11   : > { %1607 = dma.hbm_to_vmem [thread:$0]  (!%p1970_p6), %s176_s24, 3072, %s178_s28, [#allocation6], %s1889_s13, %s1889_s13, %s1890_s14  }
  0x12   : > { %1610 = dma.hbm_to_vmem [thread:$0]  (!%p1970_p6), %s191_s6, 48, %s193_s12, [#allocation6]  }
  0x13   : > { %1613 = dma.hbm_to_vmem [thread:$0]  (!%p1970_p6), %s202_s10, 1024, %s204_s16, [#allocation9], %s1892_s17, %s1892_s17, %s1893_s22  }
  0x14   : > { %s1402_s23 = sadd.s32 4294967294, %s1885_s21   ;;  %s1985_s24 = sadd.s32 1, %s1885_s21  }
  0x15   : > { %s30_s27 = sadd.s32 1, %s1881_s20  ;;  %s27_s28 = ssub.s32 %s1885_s21, %s1985_s24 }
  0x16   : > { %p37_p7 = scmp.ne.s32.totalorder %s1881_s20, %s1877_s19  ;;  %p28_p8 = scmp.eq.s32.totalorder %s27_s28, 0 }
  0x17   : > { %p38_p9 = scmp.eq.s32.totalorder %s1885_s21, 0  ;;  %p43_p10 = scmp.ne.s32.totalorder %s1877_s19, %s1873_s18 }
  0x18   : > { %p151_p11 = scmp.eq.s32.totalorder %s1953_s25, 1  ;;  %p157_p0 = scmp.eq.s32.totalorder %s1402_s23, 1 }
  0x19   : > { %s1997_s29 = scalar_select %p28_p8, %s1881_s20, %s30_s27  }
  0x1a   : > { %p2001_p12 = por %p44_p1, %p43_p10  ;;  %p2005_p13 = por %p151_p11, %p37_p7 }
  0x1b   : > { %p39_p2 = por %p38_p9, %p37_p7  ;;  %s220_s7 = sand.u32 1, %s1881_s20  }
  0x1c   : > { %p2010_p4 = por %p157_p0, %p43_p10  ;;  %p1625_p6 = scmp.lt.s32.totalorder %s1885_s21, 2 }
  0x1d   : > { %s1408_s9 = sshll.u32 %s220_s7, 2  ;;  %s1409_s10 = sshll.u32 %s1885_s21, 2 }
  0x1e   : > { %s228_s13 = scalar_lea.hbm %s2278_s0, %s1409_s10  ;;  %s224_s15 = scalar_lea.vmem [#allocation2], %s1408_s9 }
  0x1f   : > { %s230_s14 = sshll.u32 %s228_s13, 4  ;;  %s232_s16 = sshll.u32 %s224_s15, 4  ;;  %s231_s14 = int_to_ptr.hbm [resolvable:$true] %s230_s14  ;;  %s233_s16 = int_to_ptr.vmem [resolvable:$true] %s232_s16 }
  0x20   : > { %p2019_p8 = pnand %p1625_p6, %p39_p2  ;;  %s221_s22 = scalar_lea.sflag [#allocation3], %s220_s7 }
  0x21   : > { %s1781_s23 = sshra.s32 %s231_s14, 4  ;;  %s1788_s9 = scalar_lea.hbm %s2278_s0, 8  ;;  %s1782_s23 = int_to_ptr.hbm [resolvable:$true] %s1781_s23 }
  0x22   : > { %s1783_s27 = scalar_lea.hbm %s1782_s23, 4  ;;  %p1785_p9 = pneg %p2019_p8 }
  0x23   : > { %p1784_p7 = scmp.ne.s32.totalorder %s1782_s23, %s1783_s27  ;;  %p1789_p0 = scmp.lt.s32.totalorder %s1782_s23, %s2278_s0 }
  0x24   : > { %p1790_p2 = scmp.lt.s32.totalorder %s1788_s9, %s1783_s27 }
  0x25   : > { %p1786_p10 = pnand %p1785_p9, %p1784_p7 }
  0x26   : > { %p1791_p6 = por %p1790_p2, %p1789_p0 }
  0x27   : > { %p1787_p11 = pneg %p1786_p10 }
  0x29   : > { %p1792_p5 = pnand %p1791_p6, %p1787_p11 }
  0x2b   : > { %1795 = shalt.err (!%p1792_p5)
}
  0x2c   : > { %1617 = dma.hbm_to_vmem [thread:$0]  (!%p2019_p8), %s231_s14, 64, %s233_s16, %s221_s22  }
  0x2d   : > { %241 = sbr.rel (%p1958_p3) target bundleno = 1222 (0x4c6), region = 40  ;;  %s2036_s7 = sand.u32 (!%p1958_p3), 1, %s1877_s19  }
  0x2e   : > { %s1411_s13 = sshll.u32 (!%p1958_p3), %s2036_s7, 2  ;;  %s244_s15 = scalar_lea.sflag (!%p1958_p3), [#allocation3], %s2036_s7 }
  0x2f   : > { %s2040_s28 = scalar_lea.vmem (!%p1958_p3), [#allocation2], %s1411_s13 }
  0x32   : > { %1856 = dma.done.wait (%p2001_p12), %s244_s15, 64  }
  0x33   : > { %1858 = vsyncadd (%p2001_p12), %s244_s15, 4294967232 }
  0x34   : > { %1860 = dma.done.wait (%p44_p1), [#allocation6], 3120  }
  0x35   : > { %1862 = vsyncadd (%p44_p1), [#allocation6], 4294964176 }
  0x36   : > { %1864 = dma.done.wait (%p44_p1), [#allocation9], 1024  }
  0x37   : > { %1866 = vsyncadd (%p44_p1), [#allocation9], 4294966272  ;;  %v1502_v0 = vld [vmem:[#allocation5 + $0xa8] sm:$0xf]  ;;  %v1578_v1 = vld [vmem:[#allocation5 + $0xb0] sm:$0xf0] }
  0x38   : > { %v1577_v2 = vld [vmem:[#allocation5 + $0xac] sm:$0xf]  ;;  %v1503_v3 = vor.u32 %v1578_v1, %v1502_v0  ;;  %v1504_v4 = vld [vmem:[#allocation5 + $0xb4] sm:$0xf0]  ;;  %v1490_v5 = vld [vmem:[#allocation5 + $0x90] sm:$0xf] }
  0x39   : > { %v1575_v6 = vld [vmem:[#allocation5 + $0x98] sm:$0xf0]  ;;  %v1507_v7 = vor.u32 %v1577_v2, %v1504_v4  ;;  %v1574_v8 = vld [vmem:[#allocation5 + $0x94] sm:$0xf]  ;;  %v1492_v9 = vld [vmem:[#allocation5 + $0x9c] sm:$0xf0] }
  0x3a   : > { %460 = vmatpush.bf16.msra.mxu0 %v1503_v3  ;;  %v1491_v10 = vor.u32 %v1575_v6, %v1490_v5  ;;  %v1495_v11 = vor.u32 %v1574_v8, %v1492_v9  ;;  %v1478_v12 = vld [vmem:[#allocation5 + $0x78] sm:$0xf]  ;;  %v1572_v13 = vld [vmem:[#allocation5 + $0x80] sm:$0xf0]  ;;  %v1571_v14 = vld [vmem:[#allocation5 + $0x7c] sm:$0xf] }
  0x3b   : > { %473 = vmatpush.bf16.msra.mxu1 %v1507_v7  ;;  %v1480_v15 = vld [vmem:[#allocation5 + $0x84] sm:$0xf0]  ;;  %v1479_v16 = vor.u32 %v1572_v13, %v1478_v12  ;;  %v1466_v18 = vld [vmem:[#allocation5 + $0x60] sm:$0xf]  ;;  %v1569_v19 = vld [vmem:[#allocation5 + $0x68] sm:$0xf0] }
  0x3c   : > { %v1483_v17 = vor.u32 %v1571_v14, %v1480_v15  ;;  %v1568_v20 = vld [vmem:[#allocation5 + $0x64] sm:$0xf]  ;;  %v1468_v21 = vld [vmem:[#allocation5 + $0x6c] sm:$0xf0]  ;;  %v1467_v22 = vor.u32 %v1569_v19, %v1466_v18  ;;  %v1454_v24 = vld [vmem:[#allocation5 + $0x48] sm:$0xf] }
  0x3d   : > { %v1471_v23 = vor.u32 %v1568_v20, %v1468_v21  ;;  %v1566_v25 = vld [vmem:[#allocation5 + $0x50] sm:$0xf0]  ;;  %v1565_v26 = vld [vmem:[#allocation5 + $0x4c] sm:$0xf]  ;;  %v1456_v27 = vld [vmem:[#allocation5 + $0x54] sm:$0xf0] }
  0x3e   : > { %461 = vmatpush.bf16.msra.mxu0 %v1491_v10  ;;  %v1455_v28 = vor.u32 %v1566_v25, %v1454_v24  ;;  %v1459_v29 = vor.u32 %v1565_v26, %v1456_v27  ;;  %v1442_v30 = vld [vmem:[#allocation5 + $0x30] sm:$0xf]  ;;  %v1563_v31 = vld [vmem:[#allocation5 + $0x38] sm:$0xf0]  ;;  %v1562_v32 = vld [vmem:[#allocation5 + $0x34] sm:$0xf] }
  0x3f   : > { %474 = vmatpush.bf16.msra.mxu1 %v1495_v11  ;;  %v1444_v33 = vld [vmem:[#allocation5 + $0x3c] sm:$0xf0]  ;;  %v1443_v34 = vor.u32 %v1563_v31, %v1442_v30  ;;  %v1430_v36 = vld [vmem:[#allocation5 + $0x18] sm:$0xf]  ;;  %v1560_v37 = vld [vmem:[#allocation5 + $0x20] sm:$0xf0] }
  0x40   : > { %v1447_v35 = vor.u32 %v1562_v32, %v1444_v33  ;;  %v1559_v38 = vld [vmem:[#allocation5 + $0x1c] sm:$0xf]  ;;  %v1432_v39 = vld [vmem:[#allocation5 + $0x24] sm:$0xf0]  ;;  %v1431_v40 = vor.u32 %v1560_v37, %v1430_v36  ;;  %v1418_v42 = vld [vmem:[#allocation5] sm:$0xf] }
  0x41   : > { %v1435_v41 = vor.u32 %v1559_v38, %v1432_v39  ;;  %v1557_v43 = vld [vmem:[#allocation5 + $0x8] sm:$0xf0]  ;;  %v1556_v44 = vld [vmem:[#allocation5 + $0x4] sm:$0xf]  ;;  %v1420_v45 = vld [vmem:[#allocation5 + $0xc] sm:$0xf0] }
  0x42   : > { %462 = vmatpush.bf16.msra.mxu0 %v1479_v16  ;;  %v1419_v46 = vor.u32 %v1557_v43, %v1418_v42  ;;  %v1423_v47 = vor.u32 %v1556_v44, %v1420_v45  ;;  %v291_v48 = vld [vmem:[%s2040_s28] sm:$0xf]  ;;  %v1510_v49 = vld [vmem:[#allocation5 + $0xb0] sm:$0xf]  ;;  %v1576_v53 = vld [vmem:[#allocation5 + $0xa0] sm:$0xf0] }
  0x43   : > { %475 = vmatpush.bf16.msra.mxu1 %v1483_v17  ;;  %v1579_v50 = vld [vmem:[#allocation5 + $0xb8] sm:$0xf0]  ;;  %v1498_v52 = vld [vmem:[#allocation5 + $0x98] sm:$0xf]  ;;  %v1486_v54 = vld [vmem:[#allocation5 + $0x80] sm:$0xf] }
  0x44   : > { %v1511_v51 = vor.u32 %v1579_v50, %v1510_v49  ;;  %v1499_v55 = vor.u32 %v1576_v53, %v1498_v52  ;;  %v1573_v56 = vld [vmem:[#allocation5 + $0x88] sm:$0xf0]  ;;  %v1474_v58 = vld [vmem:[#allocation5 + $0x68] sm:$0xf]  ;;  %v1570_v59 = vld [vmem:[#allocation5 + $0x70] sm:$0xf0] }
  0x45   : > { %v1487_v57 = vor.u32 %v1573_v56, %v1486_v54  ;;  %v1475_v60 = vor.u32 %v1570_v59, %v1474_v58  ;;  %v1462_v61 = vld [vmem:[#allocation5 + $0x50] sm:$0xf]  ;;  %v1567_v62 = vld [vmem:[#allocation5 + $0x58] sm:$0xf0]  ;;  %v2055_v0 = vld [vmem:[#allocation7] sm:$0x7] }
  0x46   : > { %463 = vmatpush.bf16.msra.mxu0 %v1467_v22  ;;  %486 = vmatpush.bf16.msra.mxu2 %v1511_v51  ;;  %v1463_v63 = vor.u32 %v1567_v62, %v1462_v61  ;;  %v1450_v1 = vld [vmem:[#allocation5 + $0x38] sm:$0xf]  ;;  %v1564_v2 = vld [vmem:[#allocation5 + $0x40] sm:$0xf0]  ;;  %v326_v3 = vperm.slane %v2055_v0, 0  ;;  %v327_v5 = vperm.slane %v2055_v0, 1 }
  0x47   : > { %476 = vmatpush.bf16.msra.mxu1 %v1471_v23  ;;  %v1451_v4 = vor.u32 %v1564_v2, %v1450_v1  ;;  %v1438_v6 = vld [vmem:[#allocation5 + $0x20] sm:$0xf]  ;;  %v1561_v7 = vld [vmem:[#allocation5 + $0x28] sm:$0xf0]  ;;  %v1426_v13 = vld [vmem:[#allocation5 + $0x8] sm:$0xf] }
  0x48   : > { %v1439_v11 = vor.u32 %v1561_v7, %v1438_v6  ;;  %v1558_v14 = vld [vmem:[#allocation5 + $0x10] sm:$0xf0]  ;;  %s1894_s26 = smov 32   ;;  %s1895_s30 = smov 96   ;;  %v1897_v19 = vmov 1983009808  }
  0x49   : > { %v1427_v16 = vor.u32 %v1558_v14, %v1426_v13  ;;  %s1896_s14 = smov 64   ;;  %v522_v20 = vunpack.c.l.s4 %v1897_v19  ;;  %v1898_v32 = vmov 1934713408   ;;  %vm531_vm0 = vcmask 1047556   ;;  %s1553_s16 = sshll.u32 %s1953_s25, 3 }
  0x4a   : > { %464 = vmatpush.bf16.msra.mxu0 %v1455_v28  ;;  %487 = vmatpush.bf16.msra.mxu2 %v1499_v55  ;;  %v536_v33 = vunpack.c.l.s4 %v1898_v32  ;;  %vm862_vm1 = vcmask 261120   ;;  %vm939_vm2 = vcmask 64512   ;;  %vm991_vm3 = vcmask 1043456   ;;  %s1415_s17 = sshll.u32 %s2036_s7, 3  ;;  %s1298_s27 = scalar_lea.hbm %s2283_s5, %s1553_s16 }
  0x4b   : > { %477 = vmatpush.bf16.msra.mxu1 %v1459_v29  ;;  %v2062_v24 = vunpack.c.0.s8 %v522_v20  ;;  %vm1198_vm4 = vcmask 523264   ;;  %vm1201_vm5 = vcmask 785408   ;;  %s289_s11 = scalar_lea.vmem [#allocation10], %s1415_s17  ;;  %s1302_s13 = sshll.u32 %s1298_s27, 4  ;;  %s1303_s13 = int_to_ptr.hbm [resolvable:$true] %s1302_s13 }
  0x4c   : > { %v2066_v39 = vunpack.c.0.s8 %v536_v33  ;;  %s1300_s12 = sshll.u32 %s289_s11, 4  ;;  %s1288_s15 = scalar_lea.sflag [#allocation4], %s2036_s7  ;;  %s1301_s12 = int_to_ptr.vmem [resolvable:$true] %s1300_s12 }
  0x4d   : > { %s1825_s25 = sshra.s32 %s1303_s13, 4  ;;  %s1826_s25 = int_to_ptr.hbm [resolvable:$true] %s1825_s25 }
  0x4e   : > { %465 = vmatpush.bf16.msra.mxu0 %v1443_v34  ;;  %488 = vmatpush.bf16.msra.mxu2 %v1487_v57  ;;  %s1827_s28 = scalar_lea.hbm %s1826_s25, 8  ;;  %p1832_p12 = scmp.lt.s32.totalorder %s1826_s25, %s2283_s5 }
  0x4f   : > { %478 = vmatpush.bf16.msra.mxu1 %v1447_v35  ;;  %p1828_p1 = scmp.ne.s32.totalorder %s1826_s25, %s1827_s28 }
  0x51   : > { %p1829_p3 = pnand %p1828_p1, %p2005_p13 }
  0x52   : > { %466 = vmatpush.bf16.msra.mxu0 %v1431_v40  ;;  %489 = vmatpush.bf16.msra.mxu2 %v1475_v60 }
  0x53   : > { %479 = vmatpush.bf16.msra.mxu1 %v1435_v41  ;;  %p1830_p5 = pneg %p1829_p3 }
  0x56   : > { %467 = vmatpush.bf16.msra.mxu0 %v1419_v46  ;;  %490 = vmatpush.bf16.msra.mxu2 %v1463_v63 }
  0x57   : > { %480 = vmatpush.bf16.msra.mxu1 %v1423_v47 }
  0x59   : > { %468 = vmatmul.bf16.vlgmr.msra.gmra.mxu0 %v291_v48 }
  0x5a   : > { %481 = vmatmul.bf16.vlgmr.msra.gmra.mxu1 %v291_v48  ;;  %491 = vmatpush.bf16.msra.mxu2 %v1451_v4 }
  0x5e   : > { %492 = vmatpush.bf16.msra.mxu2 %v1439_v11 }
  0x62   : > { %493 = vmatpush.bf16.msra.mxu2 %v1427_v16 }
  0x65   : > { %494 = vmatmul.bf16.vlgmr.msra.gmra.mxu2 %v291_v48 }
  0xd6   : > { %v469_v8 = vpop.f32.mrf.mxu0 }
  0xd7   : > { %v470_v9 = vadd.f32 %v469_v8, %v326_v3  ;;  %v482_v10 = vpop.f32.mrf.mxu1 }
  0xd8   : > { %v483_v12 = vadd.f32 %v482_v10, %v327_v5 }
  0xda   : > { %v499_v15 = vpack.c.bf16 %v483_v12, %v470_v9 }
  0xdc   : > { %506 = vrot.lane.b32.xlu1 %v499_v15, %s1894_s26  ;;  %502 = vrot.lane.b32.xlu0 %v499_v15, %s1895_s30  ;;  %v623_v22 = vrot.slane %v499_v15, 4  ;;  %v511_v26 = vshrl.u32 %v499_v15, 16 }
  0xde   : > { %v471_v17 = vpop.f32.mrf.mxu0  ;;  %v630_v30 = vshrl.u32 %v623_v22, 16 }
  0xdf   : > { %v484_v18 = vpop.f32.mrf.mxu1 }
  0xe4   : > { %504 = vrot.lane.b32.xlu0 %v499_v15, %s1896_s14 }
  0xe8   : > { %v495_v33 = vpop.f32.mrf.mxu2 }
 0x14e   : > { %v503_v21 = vpop.permute.xlu0 %502  ;;  %v507_v28 = vpop.permute.xlu1 %506 }
 0x14f   : > { %v512_v23 = vshrl.u32 %v503_v21, 16  ;;  %v510_v25 = vpack.i.b16 %v503_v21, %v499_v15  ;;  %v624_v27 = vrot.slane %v503_v21, 4  ;;  %v626_v34 = vrot.slane %v507_v28, 4 }
 0x150   : > { %v518_v41 = vshrl.u32 %v507_v28, 16 }
 0x151   : > { %v513_v29 = vpack.i.b16 %v512_v23, %v511_v26  ;;  %v631_v31 = vshrl.u32 %v624_v27, 16  ;;  %v524_v35 = vperm.slane %v510_v25, %v2062_v24  ;;  %v629_v36 = vpack.i.b16 %v624_v27, %v623_v22 }
 0x152   : > { %v637_v45 = vshrl.u32 %v626_v34, 16 }
 0x153   : > { %v632_v37 = vpack.i.b16 %v631_v31, %v630_v30  ;;  %v551_v38 = vperm.slane %v513_v29, %v2062_v24  ;;  %v533_v46 = vrot.slane %v524_v35, 4  ;;  %v643_v47 = vperm.slane %v629_v36, %v2062_v24 }
 0x155   : > { %v669_v48 = vperm.slane %v632_v37, %v2062_v24  ;;  %v559_v53 = vrot.slane %v551_v38, 4  ;;  %v651_v58 = vrot.slane %v643_v47, 4 }
 0x156   : > { %v505_v40 = vpop.permute.xlu0 %504 }
 0x157   : > { %v516_v42 = vpack.i.b16 %v507_v28, %v505_v40  ;;  %v517_v43 = vshrl.u32 %v505_v40, 16  ;;  %v625_v44 = vrot.slane %v505_v40, 4  ;;  %v677_v59 = vrot.slane %v669_v48, 4 }
 0x159   : > { %v519_v49 = vpack.i.b16 %v518_v41, %v517_v43  ;;  %v529_v50 = vperm.slane %v516_v42, %v2062_v24  ;;  %v635_v51 = vpack.i.b16 %v626_v34, %v625_v44  ;;  %v636_v52 = vshrl.u32 %v625_v44, 16 }
 0x15b   : > { %v530_v54 = vrot.slane %v529_v50, 4  ;;  %v534_v55 = vsel %vm531_vm0, %v529_v50, %v533_v46  ;;  %v556_v56 = vperm.slane %v519_v49, %v2062_v24  ;;  %v638_v57 = vpack.i.b16 %v637_v45, %v636_v52 }
 0x15c   : > { %v542_v60 = vperm.slane %v534_v55, %v2066_v39  ;;  %v648_v61 = vperm.slane %v635_v51, %v2062_v24  ;;  %v328_v52 = vperm.slane %v2055_v0, 2 }
 0x15d   : > { %v532_v62 = vsel %vm531_vm0, %v530_v54, %v524_v35  ;;  %v557_v63 = vrot.slane %v556_v56, 4  ;;  %v560_v1 = vsel %vm531_vm0, %v556_v56, %v559_v53  ;;  %v674_v2 = vperm.slane %v638_v57, %v2062_v24 }
 0x15e   : > { %v538_v3 = vperm.slane %v532_v62, %v2066_v39  ;;  %v545_v4 = vrot.slane %v542_v60, 4  ;;  %v568_v5 = vperm.slane %v560_v1, %v2066_v39  ;;  %v649_v6 = vrot.slane %v648_v61, 4 }
 0x15f   : > { %v558_v7 = vsel %vm531_vm0, %v557_v63, %v551_v38  ;;  %v652_v8 = vsel %vm531_vm0, %v648_v61, %v651_v58  ;;  %v675_v9 = vrot.slane %v674_v2, 4  ;;  %v678_v10 = vsel %vm531_vm0, %v674_v2, %v677_v59  ;;  %v497_v63 = vpop.f32.mrf.mxu2 }
 0x160   : > { %v543_v11 = vrot.slane %v538_v3, 4  ;;  %v546_v12 = vsel %vm531_vm0, 0, %v545_v4  ;;  %v564_v13 = vperm.slane %v558_v7, %v2066_v39  ;;  %v571_v14 = vrot.slane %v568_v5, 4 }
 0x161   : > { %v578_v15 = vrot.slane %v546_v12, 4  ;;  %v650_v16 = vsel %vm531_vm0, %v649_v6, %v643_v47  ;;  %v660_v17 = vperm.slane %v652_v8, %v2066_v39  ;;  %v676_v18 = vsel %vm531_vm0, %v675_v9, %v669_v48 }
 0x162   : > { %v544_v19 = vsel %vm531_vm0, 0, %v543_v11  ;;  %v569_v20 = vrot.slane %v564_v13, 4  ;;  %v572_v21 = vsel %vm531_vm0, 0, %v571_v14  ;;  %v656_v22 = vperm.slane %v650_v16, %v2066_v39 }
 0x163   : > { %v663_v23 = vrot.slane %v660_v17, 4  ;;  %v682_v25 = vperm.slane %v676_v18, %v2066_v39  ;;  %v686_v26 = vperm.slane %v678_v10, %v2066_v39  ;;  %v579_v28 = vsel %vm531_vm0, %v578_v15, %v544_v19 }
 0x164   : > { %v661_v27 = vrot.slane %v656_v22, 4  ;;  %v597_v29 = vrot.slane %v572_v21, 4  ;;  %v570_v36 = vsel %vm531_vm0, 0, %v569_v20  ;;  %v583_v40 = vperm.slane %v579_v28, %v2062_v24 }
 0x165   : > { %v664_v30 = vsel %vm531_vm0, 0, %v663_v23  ;;  %v689_v31 = vrot.slane %v686_v26, 4  ;;  %v687_v32 = vrot.slane %v682_v25, 4  ;;  %v691_v41 = vsel %vm531_vm0, %v663_v23, %v656_v22 }
 0x166   : > { %v696_v34 = vrot.slane %v664_v30, 4  ;;  %v662_v35 = vsel %vm531_vm0, 0, %v661_v27  ;;  %v573_v44 = vsel %vm531_vm0, %v545_v4, %v538_v3  ;;  %v592_v47 = vsel %vm531_vm0, %v571_v14, %v564_v13 }
 0x167   : > { %v690_v37 = vsel %vm531_vm0, 0, %v689_v31  ;;  %v688_v38 = vsel %vm531_vm0, 0, %v687_v32  ;;  %v710_v46 = vsel %vm531_vm0, %v689_v31, %v682_v25  ;;  %v598_v48 = vsel %vm531_vm0, %v597_v29, %v570_v36 }
 0x168   : > { %v697_v42 = vsel %vm531_vm0, %v696_v34, %v662_v35  ;;  %v715_v43 = vrot.slane %v690_v37, 4  ;;  %v584_v50 = vrot.slane %v583_v40, 4  ;;  %v602_v51 = vperm.slane %v598_v48, %v2062_v24 }
 0x169   : > { %v701_v45 = vperm.slane %v697_v42, %v2062_v24  ;;  %v695_v53 = vperm.slane %v691_v41, %v2062_v24  ;;  %v577_v56 = vperm.slane %v573_v44, %v2062_v24  ;;  %v596_v57 = vperm.slane %v592_v47, %v2062_v24 }
 0x16a   : > { %v716_v49 = vsel %vm531_vm0, %v715_v43, %v688_v38  ;;  %v603_v58 = vrot.slane %v602_v51, 4  ;;  %v496_v59 = vadd.f32 %v495_v33, %v328_v52  ;;  %v714_v61 = vperm.slane %v710_v46, %v2062_v24 }
 0x16b   : > { %v702_v54 = vrot.slane %v701_v45, 4  ;;  %v720_v55 = vperm.slane %v716_v49, %v2062_v24  ;;  %v585_v0 = vsel %vm531_vm0, %v584_v50, %v577_v56 }
 0x16c   : > { %v604_v2 = vsel %vm531_vm0, %v603_v58, %v596_v57  ;;  %v2119_v3 = vpack.c.bf16 %v496_v59, %v496_v59  ;;  %v589_v9 = vperm.slane %v585_v0, %v2066_v39 }
 0x16d   : > { %v703_v60 = vsel %vm531_vm0, %v702_v54, %v695_v53  ;;  %v721_v62 = vrot.slane %v720_v55, 4  ;;  %v608_v7 = vperm.slane %v604_v2, %v2066_v39 }
 0x16e   : > { %v707_v1 = vperm.slane %v703_v60, %v2066_v39  ;;  %742 = vrot.lane.b32.xlu2 %v2119_v3, %s1895_s30  ;;  %v590_v21 = vrot.slane %v589_v9, 4  ;;  %v614_v34 = vshrl.u32 %v589_v9, 16 }
 0x16f   : > { %v722_v4 = vsel %vm531_vm0, %v721_v62, %v714_v61  ;;  %v609_v17 = vrot.slane %v608_v7, 4  ;;  %v613_v27 = vpack.i.b16 %v608_v7, %v589_v9  ;;  %v615_v33 = vshrl.u32 %v608_v7, 16 }
 0x170   : > { %v726_v5 = vperm.slane %v722_v4, %v2066_v39  ;;  %v708_v6 = vrot.slane %v707_v1, 4  ;;  %v732_v8 = vshrl.u32 %v707_v1, 16  ;;  %v591_v28 = vsel %vm531_vm0, 0, %v590_v21 }
 0x171   : > { %v610_v25 = vsel %vm531_vm0, 0, %v609_v17  ;;  %v620_v31 = vshrl.u32 %v591_v28, 16  ;;  %v616_v35 = vpack.i.b16 %v615_v33, %v614_v34 }
 0x172   : > { %v731_v10 = vpack.i.b16 %v726_v5, %v707_v1  ;;  %v733_v11 = vshrl.u32 %v726_v5, 16  ;;  %v709_v12 = vsel %vm531_vm0, 0, %v708_v6  ;;  %v727_v13 = vrot.slane %v726_v5, 4 }
 0x173   : > { %v738_v18 = vshrl.u32 %v709_v12, 16  ;;  %v621_v29 = vshrl.u32 %v610_v25, 16  ;;  %v619_v36 = vpack.i.b16 %v610_v25, %v591_v28  ;;  %v751_v5 = vshrl.u32 %v2119_v3, 16 }
 0x174   : > { %v867_v14 = vsel %vm862_vm1, %v731_v10, 0  ;;  %v734_v15 = vpack.i.b16 %v733_v11, %v732_v8  ;;  %v728_v16 = vsel %vm531_vm0, 0, %v727_v13 }
 0x175   : > { %876 = vmatpush.bf16.xpose.msra.mxu3 %v867_v14  ;;  %v739_v19 = vshrl.u32 %v728_v16, 16  ;;  %v737_v23 = vpack.i.b16 %v728_v16, %v709_v12  ;;  %v622_v32 = vpack.i.b16 %v621_v29, %v620_v31 }
 0x176   : > { %v886_v20 = vsel %vm862_vm1, %v734_v15, 0  ;;  %744 = vrot.lane.b32.xlu2 %v2119_v3, %s1896_s14 }
 0x177   : > { %v740_v22 = vpack.i.b16 %v739_v19, %v738_v18  ;;  %v905_v30 = vsel %vm862_vm1, %v737_v23, 0 }
 0x179   : > { %v924_v26 = vsel %vm862_vm1, %v740_v22, 0 }
 0x17a   : > { %933 = vmatpush.bf16.xpose.msrb.mxu0 %v924_v26 }
 0x17c   : > { %1512 = vmatmul.msk.bf16.vlgmr.msra.gmra.mxu3 %vm862_vm1, %v613_v27 }
 0x17d   : > { %895 = vmatpush.bf16.xpose.msrb.mxu3 %v886_v20 }
 0x181   : > { %1515 = vmatmul.msk.bf16.vlgmr.msrb.gmra.mxu0 %vm862_vm1, %v622_v32 }
 0x185   : > { %914 = vmatpush.bf16.xpose.msra.mxu3 %v905_v30 }
 0x18c   : > { %1513 = vmatmul.msk.bf16.vlgmr.msrb.gmra.mxu3 %vm862_vm1, %v616_v35 }
 0x19c   : > { %1514 = vmatmul.msk.bf16.vlgmr.msra.gmra.mxu3 %vm862_vm1, %v619_v36 }
 0x1c8   : > { %v743_v50 = vpop.permute.xlu2 %742 }
 0x1c9   : > { %v752_v6 = vshrl.u32 %v743_v50, 16  ;;  %v750_v8 = vpack.i.b16 %v743_v50, %v2119_v3 }
 0x1cb   : > { %v753_v10 = vpack.i.b16 %v752_v6, %v751_v5  ;;  %v764_v11 = vperm.slane %v750_v8, %v2062_v24 }
 0x1cd   : > { %v790_v13 = vperm.slane %v753_v10, %v2062_v24  ;;  %v772_v18 = vrot.slane %v764_v11, 4 }
 0x1cf   : > { %v798_v21 = vrot.slane %v790_v13, 4 }
 0x1d0   : > { %v745_v57 = vpop.permute.xlu2 %744 }
 0x1d1   : > { %v757_v14 = vshrl.u32 %v745_v57, 16 }
 0x1fe   : > { %v935_v37 = vpop.f32.mrf.mxu0 }
 0x1ff   : > { %v878_v38 = vpop.f32.mrf.mxu3  ;;  %v949_v40 = vsel %vm939_vm2, %v935_v37, -inf }
 0x200   : > { %950 = vmax.xlane.f32.xlu0 %v949_v40  ;;  %v940_v41 = vsel %vm939_vm2, %v878_v38, -inf }
 0x201   : > { %941 = vmax.xlane.f32.xlu1 %v940_v41 }
 0x206   : > { %v937_v42 = vpop.f32.mrf.mxu0 }
 0x207   : > { %v880_v43 = vpop.f32.mrf.mxu3 }
 0x20f   : > { %v897_v44 = vpop.f32.mrf.mxu3 }
 0x210   : > { %v943_v45 = vsel %vm939_vm2, %v897_v44, -inf }
 0x211   : > { %944 = vmax.xlane.f32.xlu2 %v943_v45 }
 0x217   : > { %v899_v46 = vpop.f32.mrf.mxu3 }
 0x21f   : > { %v916_v47 = vpop.f32.mrf.mxu3 }
 0x220   : > { %v946_v48 = vsel %vm939_vm2, %v916_v47, -inf }
 0x221   : > { %947 = vmax.xlane.f32.xlu2 %v946_v48 }
 0x227   : > { %v918_v49 = vpop.f32.mrf.mxu3 }
 0x239   : > { %746 = vrot.lane.b32.xlu2 %v2119_v3, %s1894_s26 }
 0x273   : > { %v951_v51 = vpop.xlane.xlu0 %950 }
 0x274   : > { %v942_v52 = vpop.xlane.xlu1 %941  ;;  %v955_v54 = vsub.f32 %v935_v37, %v951_v51 }
 0x275   : > { %v952_v53 = vsub.f32 %v878_v38, %v942_v52 }
 0x276   : > { %v962_v56 = vmul.f32 1.442695, %v955_v54 }
 0x277   : > { %v956_v55 = vmul.f32 1.442695, %v952_v53 }
 0x279   : > { %1675 = vpow2.f32 %v956_v55 }
 0x27a   : > { %1677 = vpow2.f32 %v962_v56 }
 0x27f   : > { %v2147_v58 = vpop.eup %1675 }
 0x280   : > { %v964_v59 = vsel %vm939_vm2, %v2147_v58, 0.0  ;;  %v2151_v61 = vpop.eup %1677 }
 0x281   : > { %965 = vadd.xlane.f32.xlu1 %v964_v59  ;;  %v973_v1 = vsel %vm939_vm2, %v2151_v61, 0.0 }
 0x284   : > { %v945_v60 = vpop.xlane.xlu2 %944 }
 0x285   : > { %v953_v62 = vsub.f32 %v897_v44, %v945_v60 }
 0x287   : > { %v958_v63 = vmul.f32 1.442695, %v953_v62 }
 0x289   : > { %1679 = vpow2.f32 %v958_v63  ;;  %974 = vadd.xlane.f32.xlu1 %v973_v1 }
 0x28f   : > { %v2155_v0 = vpop.eup %1679 }
 0x290   : > { %v967_v2 = vsel %vm939_vm2, %v2155_v0, 0.0 }
 0x291   : > { %968 = vadd.xlane.f32.xlu2 %v967_v2 }
 0x294   : > { %v948_v4 = vpop.xlane.xlu2 %947 }
 0x295   : > { %v954_v7 = vsub.f32 %v916_v47, %v948_v4 }
 0x297   : > { %v960_v9 = vmul.f32 1.442695, %v954_v7 }
 0x299   : > { %1681 = vpow2.f32 %v960_v9 }
 0x29c   : > { %v747_v12 = vpop.permute.xlu2 %746 }
 0x29d   : > { %v756_v15 = vpack.i.b16 %v747_v12, %v745_v57  ;;  %v758_v16 = vshrl.u32 %v747_v12, 16 }
 0x29f   : > { %v2163_v17 = vpop.eup %1681  ;;  %v759_v19 = vpack.i.b16 %v758_v16, %v757_v14  ;;  %v769_v20 = vperm.slane %v756_v15, %v2062_v24 }
 0x2a0   : > { %v970_v3 = vsel %vm939_vm2, %v2163_v17, 0.0 }
 0x2a1   : > { %v770_v22 = vrot.slane %v769_v20, 4  ;;  %v773_v23 = vsel %vm531_vm0, %v769_v20, %v772_v18  ;;  %v795_v25 = vperm.slane %v759_v19, %v2062_v24  ;;  %971 = vadd.xlane.f32.xlu0 %v970_v3 }
 0x2a2   : > { %v781_v26 = vperm.slane %v773_v23, %v2066_v39 }
 0x2a3   : > { %v771_v27 = vsel %vm531_vm0, %v770_v22, %v764_v11  ;;  %v796_v28 = vrot.slane %v795_v25, 4  ;;  %v799_v29 = vsel %vm531_vm0, %v795_v25, %v798_v21 }
 0x2a4   : > { %v777_v30 = vperm.slane %v771_v27, %v2066_v39  ;;  %v784_v31 = vrot.slane %v781_v26, 4  ;;  %v807_v32 = vperm.slane %v799_v29, %v2066_v39 }
 0x2a5   : > { %v797_v33 = vsel %vm531_vm0, %v796_v28, %v790_v13 }
 0x2a6   : > { %v782_v34 = vrot.slane %v777_v30, 4  ;;  %v785_v35 = vsel %vm531_vm0, 0, %v784_v31  ;;  %v803_v36 = vperm.slane %v797_v33, %v2066_v39  ;;  %v810_v37 = vrot.slane %v807_v32, 4 }
 0x2a7   : > { %v817_v38 = vrot.slane %v785_v35, 4  ;;  %v812_v44 = vsel %vm531_vm0, %v784_v31, %v777_v30 }
 0x2a8   : > { %v783_v40 = vsel %vm531_vm0, 0, %v782_v34  ;;  %v808_v41 = vrot.slane %v803_v36, 4  ;;  %v811_v42 = vsel %vm531_vm0, 0, %v810_v37  ;;  %v831_v48 = vsel %vm531_vm0, %v810_v37, %v803_v36 }
 0x2a9   : > { %v836_v43 = vrot.slane %v811_v42, 4  ;;  %v818_v45 = vsel %vm531_vm0, %v817_v38, %v783_v40  ;;  %v816_v50 = vperm.slane %v812_v44, %v2062_v24  ;;  %v835_v54 = vperm.slane %v831_v48, %v2062_v24 }
 0x2aa   : > { %v809_v46 = vsel %vm531_vm0, 0, %v808_v41  ;;  %v822_v47 = vperm.slane %v818_v45, %v2062_v24 }
 0x2ab   : > { %v837_v49 = vsel %vm531_vm0, %v836_v43, %v809_v46 }
 0x2ac   : > { %v823_v51 = vrot.slane %v822_v47, 4  ;;  %v841_v52 = vperm.slane %v837_v49, %v2062_v24 }
 0x2ae   : > { %v824_v53 = vsel %vm531_vm0, %v823_v51, %v816_v50  ;;  %v842_v55 = vrot.slane %v841_v52, 4 }
 0x2af   : > { %v828_v56 = vperm.slane %v824_v53, %v2066_v39 }
 0x2b0   : > { %v843_v57 = vsel %vm531_vm0, %v842_v55, %v835_v54 }
 0x2b1   : > { %v847_v59 = vperm.slane %v843_v57, %v2066_v39  ;;  %v829_v60 = vrot.slane %v828_v56, 4  ;;  %v853_v62 = vshrl.u32 %v828_v56, 16 }
 0x2b3   : > { %v852_v63 = vpack.i.b16 %v847_v59, %v828_v56  ;;  %v854_v1 = vshrl.u32 %v847_v59, 16  ;;  %v830_v2 = vsel %vm531_vm0, 0, %v829_v60  ;;  %v848_v4 = vrot.slane %v847_v59, 4 }
 0x2b4   : > { %v859_v9 = vshrl.u32 %v830_v2, 16 }
 0x2b5   : > { %v993_v5 = vsel %vm991_vm3, %v852_v63, 0  ;;  %v855_v6 = vpack.i.b16 %v854_v1, %v853_v62  ;;  %v849_v7 = vsel %vm531_vm0, 0, %v848_v4  ;;  %v1587_v63 = vld [vmem:[#allocation8 + $0x38] sm:$0xff] }
 0x2b6   : > { %1002 = vmatpush.bf16.msrb.mxu2 %v993_v5  ;;  %v858_v8 = vpack.i.b16 %v849_v7, %v830_v2  ;;  %v860_v10 = vshrl.u32 %v849_v7, 16  ;;  %1273 = vmatpush.bf16.msrb.mxu1 %v1587_v63 }
 0x2b7   : > { %v1012_v11 = vsel %vm991_vm3, %v855_v6, 0  ;;  %v1586_v6 = vld [vmem:[#allocation8 + $0x30] sm:$0xff] }
 0x2b8   : > { %v1031_v12 = vsel %vm991_vm3, %v858_v8, 0  ;;  %v861_v13 = vpack.i.b16 %v860_v10, %v859_v9 }
 0x2b9   : > { %1040 = vmatpush.bf16.msrb.mxu3 %v1031_v12 }
 0x2ba   : > { %1021 = vmatpush.bf16.msra.mxu2 %v1012_v11  ;;  %v1050_v14 = vsel %vm991_vm3, %v861_v13, 0  ;;  %1274 = vmatpush.bf16.msrb.mxu1 %v1586_v6 }
 0x2bb   : > { %1059 = vmatpush.bf16.msra.mxu0 %v1050_v14 }
 0x2f4   : > { %v966_v15 = vpop.xlane.xlu1 %965 }
 0x2f5   : > { %1683 = vrcp.f32 %v966_v15 }
 0x2fb   : > { %v1684_v16 = vpop.eup %1683 }
 0x2fc   : > { %v980_v18 = vmul.f32 %v1684_v16, %v2147_v58  ;;  %v975_v19 = vpop.xlane.xlu1 %974 }
 0x2fd   : > { %1685 = vrcp.f32 %v975_v19  ;;  %v1585_v19 = vld [vmem:[#allocation8 + $0x28] sm:$0xff] }
 0x2fe   : > { %v984_v20 = vpack.c.bf16 %v980_v18, %v980_v18  ;;  %1275 = vmatpush.bf16.msrb.mxu1 %v1585_v19 }
 0x300   : > { %1516 = vmatmul.msk.bf16.vlgmr.msrb.gmra.mxu2 %vm939_vm2, %v984_v20 }
 0x303   : > { %v1686_v3 = vpop.eup %1685 }
 0x304   : > { %v983_v21 = vmul.f32 %v1686_v3, %v2151_v61  ;;  %v969_v22 = vpop.xlane.xlu2 %968 }
 0x305   : > { %1687 = vrcp.f32 %v969_v22 }
 0x306   : > { %v987_v23 = vpack.c.bf16 %v983_v21, %v983_v21 }
 0x308   : > { %1519 = vmatmul.msk.bf16.vlgmr.msra.gmra.mxu0 %vm939_vm2, %v987_v23 }
 0x30b   : > { %v1688_v25 = vpop.eup %1687 }
 0x30c   : > { %v981_v26 = vmul.f32 %v1688_v25, %v2155_v0 }
 0x30e   : > { %v985_v27 = vpack.c.bf16 %v981_v26, %v981_v26 }
 0x310   : > { %1517 = vmatmul.msk.bf16.vlgmr.msra.gmra.mxu2 %vm939_vm2, %v985_v27  ;;  %v1584_v27 = vld [vmem:[#allocation8 + $0x20] sm:$0xff] }
 0x311   : > { %1276 = vmatpush.bf16.msrb.mxu1 %v1584_v27 }
 0x314   : > { %v972_v58 = vpop.xlane.xlu0 %971 }
 0x315   : > { %1689 = vrcp.f32 %v972_v58 }
 0x31b   : > { %v1690_v28 = vpop.eup %1689 }
 0x31c   : > { %v982_v29 = vmul.f32 %v1690_v28, %v2163_v17 }
 0x31e   : > { %v986_v30 = vpack.c.bf16 %v982_v29, %v982_v29 }
 0x320   : > { %1518 = vmatmul.msk.bf16.vlgmr.msrb.gmra.mxu3 %vm939_vm2, %v986_v30 }
 0x383   : > { %v1004_v61 = vpop.f32.mrf.mxu2 }
 0x384   : > { %v1065_v37 = vpack.c.bf16 %v1004_v61, %v1004_v61 }
 0x385   : > { %v1061_v31 = vpop.f32.mrf.mxu0 }
 0x386   : > { %v1072_v38 = vshrl.u32 %v1065_v37, 16  ;;  %v1068_v41 = vpack.c.bf16 %v1061_v31, %v1061_v31 }
 0x388   : > { %v1079_v45 = vshrl.u32 %v1068_v41, 16 }
 0x38b   : > { %v1006_v32 = vpop.f32.mrf.mxu2 }
 0x38d   : > { %v1063_v33 = vpop.f32.mrf.mxu0 }
 0x38e   : > { %v1583_v33 = vld [vmem:[#allocation8 + $0x18] sm:$0xff] }
 0x38f   : > { %1277 = vmatpush.bf16.msrb.mxu1 %v1583_v33 }
 0x393   : > { %v1023_v34 = vpop.f32.mrf.mxu2 }
 0x394   : > { %v1066_v35 = vpack.c.bf16 %v1023_v34, %v1023_v34 }
 0x396   : > { %v1073_v0 = vshrl.u32 %v1066_v35, 16  ;;  %v1071_v40 = vpack.i.b16 %v1066_v35, %v1065_v37 }
 0x398   : > { %v1074_v42 = vpack.i.b16 %v1073_v0, %v1072_v38  ;;  %v1085_v44 = vperm.slane %v1071_v40, %v2062_v24 }
 0x39a   : > { %v1111_v46 = vperm.slane %v1074_v42, %v2062_v24  ;;  %v1093_v49 = vrot.slane %v1085_v44, 4 }
 0x39b   : > { %v1025_v36 = vpop.f32.mrf.mxu2 }
 0x39c   : > { %v1119_v52 = vrot.slane %v1111_v46, 4 }
 0x3a3   : > { %v1042_v43 = vpop.f32.mrf.mxu3 }
 0x3a4   : > { %v1067_v17 = vpack.c.bf16 %v1042_v43, %v1042_v43 }
 0x3a6   : > { %v1077_v47 = vpack.i.b16 %v1068_v41, %v1067_v17  ;;  %v1078_v48 = vshrl.u32 %v1067_v17, 16 }
 0x3a8   : > { %v1080_v50 = vpack.i.b16 %v1079_v45, %v1078_v48  ;;  %v1090_v51 = vperm.slane %v1077_v47, %v2062_v24 }
 0x3aa   : > { %v1091_v53 = vrot.slane %v1090_v51, 4  ;;  %v1094_v54 = vsel %vm531_vm0, %v1090_v51, %v1093_v49  ;;  %v1116_v55 = vperm.slane %v1080_v50, %v2062_v24  ;;  %v1581_v49 = vld [vmem:[#allocation8 + $0x8] sm:$0xff]  ;;  %v1580_v50 = vld [vmem:[#allocation8] sm:$0xff] }
 0x3ab   : > { %v1102_v56 = vperm.slane %v1094_v54, %v2066_v39  ;;  %v1044_v57 = vpop.f32.mrf.mxu3 }
 0x3ac   : > { %v1092_v59 = vsel %vm531_vm0, %v1091_v53, %v1085_v44  ;;  %v1117_v60 = vrot.slane %v1116_v55, 4  ;;  %v1120_v62 = vsel %vm531_vm0, %v1116_v55, %v1119_v52  ;;  %v1674_v57 = vld [vmem:[%s2282_s4] ss:$0 sm:$0xff] }
 0x3ad   : > { %v1098_v1 = vperm.slane %v1092_v59, %v2066_v39  ;;  %v1105_v2 = vrot.slane %v1102_v56, 4  ;;  %v1128_v4 = vperm.slane %v1120_v62, %v2066_v39 }
 0x3ae   : > { %v1118_v5 = vsel %vm531_vm0, %v1117_v60, %v1111_v46 }
 0x3af   : > { %v1103_v7 = vrot.slane %v1098_v1, 4  ;;  %v1106_v8 = vsel %vm531_vm0, 0, %v1105_v2  ;;  %v1124_v9 = vperm.slane %v1118_v5, %v2066_v39  ;;  %v1131_v10 = vrot.slane %v1128_v4, 4 }
 0x3b0   : > { %v1138_v11 = vrot.slane %v1106_v8, 4  ;;  %v1133_v15 = vsel %vm531_vm0, %v1105_v2, %v1098_v1 }
 0x3b1   : > { %v1104_v12 = vsel %vm531_vm0, 0, %v1103_v7  ;;  %v1129_v13 = vrot.slane %v1124_v9, 4  ;;  %v1132_v14 = vsel %vm531_vm0, 0, %v1131_v10  ;;  %v1152_v21 = vsel %vm531_vm0, %v1131_v10, %v1124_v9 }
 0x3b2   : > { %v1139_v16 = vsel %vm531_vm0, %v1138_v11, %v1104_v12  ;;  %v1157_v18 = vrot.slane %v1132_v14, 4  ;;  %v1137_v23 = vperm.slane %v1133_v15, %v2062_v24  ;;  %v1156_v28 = vperm.slane %v1152_v21, %v2062_v24 }
 0x3b3   : > { %v1130_v20 = vsel %vm531_vm0, 0, %v1129_v13  ;;  %v1143_v3 = vperm.slane %v1139_v16, %v2062_v24 }
 0x3b4   : > { %v1158_v22 = vsel %vm531_vm0, %v1157_v18, %v1130_v20 }
 0x3b5   : > { %v1144_v25 = vrot.slane %v1143_v3, 4  ;;  %v1162_v26 = vperm.slane %v1158_v22, %v2062_v24  ;;  %v1582_v24 = vld [vmem:[#allocation8 + $0x10] sm:$0xff] }
 0x3b6   : > { %1278 = vmatpush.bf16.msrb.mxu1 %v1582_v24 }
 0x3b7   : > { %v1145_v58 = vsel %vm531_vm0, %v1144_v25, %v1137_v23  ;;  %v1163_v29 = vrot.slane %v1162_v26, 4 }
 0x3b8   : > { %v1149_v30 = vperm.slane %v1145_v58, %v2066_v39 }
 0x3b9   : > { %v1164_v61 = vsel %vm531_vm0, %v1163_v29, %v1156_v28 }
 0x3ba   : > { %v1168_v31 = vperm.slane %v1164_v61, %v2066_v39  ;;  %v1150_v32 = vrot.slane %v1149_v30, 4  ;;  %v1174_v34 = vshrl.u32 %v1149_v30, 16  ;;  %1279 = vmatpush.bf16.msrb.mxu1 %v1581_v49 }
 0x3bc   : > { %v1175_v35 = vshrl.u32 %v1168_v31, 16  ;;  %v1169_v36 = vrot.slane %v1168_v31, 4  ;;  %v1173_v37 = vpack.i.b16 %v1168_v31, %v1149_v30  ;;  %v1151_v0 = vsel %vm531_vm0, 0, %v1150_v32 }
 0x3bd   : > { %v1180_v44 = vshrl.u32 %v1151_v0, 16 }
 0x3be   : > { %v1176_v38 = vpack.i.b16 %v1175_v35, %v1174_v34  ;;  %v1170_v40 = vsel %vm531_vm0, 0, %v1169_v36  ;;  %1280 = vmatpush.bf16.msrb.mxu1 %v1580_v50 }
 0x3bf   : > { %v1179_v41 = vpack.i.b16 %v1170_v40, %v1151_v0  ;;  %v1181_v42 = vshrl.u32 %v1170_v40, 16 }
 0x3c0   : > { %v1183_v43 = vunpack.c.l.b16 %v1176_v38 }
 0x3c1   : > { %v1187_v17 = vunpack.c.l.b16 %v1179_v41  ;;  %v1182_v45 = vpack.i.b16 %v1181_v42, %v1180_v44 }
 0x3c2   : > { %v1184_v39 = vpack.c.b16 %v1183_v43, %v1183_v43 }
 0x3c3   : > { %v1188_v46 = vpack.c.b16 %v1187_v17, %v1187_v17  ;;  %v1191_v47 = vunpack.c.l.b16 %v1182_v45 }
 0x3c4   : > { %1185 = vrot.lane.b32.xlu0 %v1184_v39, %s1894_s26 }
 0x3c5   : > { %1189 = vrot.lane.b32.xlu1 %v1188_v46, %s1896_s14  ;;  %v1192_v48 = vpack.c.b16 %v1191_v47, %v1191_v47  ;;  %s1831_s14 = scalar_lea.hbm %s2283_s5, 16 }
 0x3c6   : > { %p1833_p8 = scmp.lt.s32.totalorder %s1831_s14, %s1827_s28 }
 0x3c8   : > { %p1834_p7 = por %p1833_p8, %p1832_p12 }
 0x3ca   : > { %p1835_p9 = pnand %p1834_p7, %p1830_p5 }
 0x3cc   : > { %1193 = vrot.lane.b32.xlu0 %v1192_v48, %s1895_s30 }
 0x436   : > { %v1186_v51 = vpop.permute.xlu0 %1185 }
 0x437   : > { %v1197_v52 = vsel %vm862_vm1, %v1173_v37, %v1186_v51  ;;  %v1190_v53 = vpop.permute.xlu1 %1189 }
 0x438   : > { %v1200_v54 = vsel %vm1198_vm4, %v1197_v52, %v1190_v53 }
 0x43e   : > { %v1194_v55 = vpop.permute.xlu0 %1193 }
 0x43f   : > { %v1203_v56 = vsel %vm1201_vm5, %v1200_v54, %v1194_v55 }
 0x440   : > { %1281 = vmatmul.bf16.vlgmr.msrb.gmra.mxu1 %v1203_v56 }
 0x4bd   : > { %v1282_v59 = vpop.f32.mrf.mxu1 }
 0x4be   : > { %v1283_v60 = vadd.f32 %v1674_v57, %v1282_v59 }
 0x4c0   : > { %1286 = vst [vmem:[%s289_s11] sm:$0xff] %v1283_v60 }
 0x4c1   : > { %1838 = shalt.err (!%p1835_p9)
}
 0x4c2   : > { %1602 = dma.vmem_to_hbm [thread:$0]  (%p2005_p13), %s1301_s12, 128, %s1303_s13, %s1288_s15  }
 0x4c5   : > { %v1284_v62 = vpop.f32.mrf.mxu1 }
 0x4c6 PF: > { %s1314_s7 = sand.u32 1, %s1873_s18   ;;  %p2290_p10 = scmp.ge.s32.totalorder %s1885_s21, 2 }
 0x4c7   : > { %s1315_s22 = scalar_lea.sflag [#allocation4], %s1314_s7 }
 0x4c8   : > { %p1619_p11 = pnand %p2290_p10, %p2010_p4 }
 0x4ca   : > { %p1620_p0 = pneg %p1619_p11 }
 0x4cc   : > { %1868 = dma.done.wait (%p1620_p0), %s1315_s22, 128  }
 0x4cd   : > { %1870 = vsyncadd (%p1620_p0), %s1315_s22, 4294967168  ;;  %p20_p2 = scmp.ge.s32.totalorder %s1985_s24, 4   ;;  %s2291_s18 = smov %s1877_s19 }
 0x4ce   : > { %s2292_s19 = smov %s1881_s20  ;;  %s2293_s20 = smov %s1997_s29 }
 0x4cf   : > { %s2294_s21 = smov %s1985_s24  ;;  %22 = sbr.rel (!%p20_p2) target bundleno = 7 (0x7), region = 97 }
 0x4d4   :  { %1321 = vsyncpa [#allocation3], 1 }
 0x4d5   :  { %1323 = vsyncpa [#allocation3 + $0x1], 1 }
 0x4d6   :  { %1324 = vsyncpa [#allocation6], 1 }
 0x4d7   :  { %1325 = vsyncpa [#allocation9], 1 }
 0x4d8   :  { %1326 = vsyncpa [#allocation4], 1 }
 0x4d9   :  { %1328 = vsyncpa [#allocation4 + $0x1], 1 }

</bundles_post_ra>
